<compile_context>
chip_gen: v6e
topology: v6e:2x2x1
jax: 0.10.0
libtpu: 0.0.40
codegen_flags: <defaults>
</compile_context>

<pallas_src>
import functools
import numpy as np
import jax
import jax.numpy as jnp
from jax.experimental import pallas as pl
from jax.experimental.pallas import tpu as pltpu

LANE = 128                 # TPU lane width
_MERGE_MAX_DEPTH = 256     # merged-tap contraction budget (v6e/v7x MXU; use 128 on v5e)
_SUBLANE = 8               # f32 native sublane tile (alignment for the tap concat)


def _round_up(x, m):
    return (x + m - 1) // m * m


# ----------------------------------------------------------------------------
# In-kernel building blocks
# ----------------------------------------------------------------------------
def _rolled(x, sp, L, Lp, masks):
    """Per-sample circular shift: out[:, j] = x[:, (j - sp) % L] for j < L.

    Lanes j >= L (zero padding up to Lp) may hold arbitrary finite values; they
    never leak into valid lanes and are re-zeroed by the downsample matmul.
    Two XLU lane rotates + one hoisted-mask select; when L is already a
    multiple of 128 (Lp == L) a single rotate suffices and no mask is needed.
    """
    if sp == 0:
        return x
    r1 = pltpu.roll(x, shift=sp, axis=1)
    if Lp == L:
        return r1
    r2 = pltpu.roll(x, shift=(sp - L) % Lp, axis=1)
    return jnp.where(masks[sp], r1, r2)


def _circ_conv(x, w, k, merged, L, Lp, masks):
    """Circular Conv1d (stride 1, no bias) of one sample.

    x: (Cin, Lp) f32 -> (Cout, Lp) f32 (MXU, bf16 operands, f32 accumulation).
    merged=True: the K shifted taps are stacked along sublanes into a
    (K*Cin, Lp) RHS and contracted in ONE matmul against the pre-merged
    (Cout, K*Cin) weight (better MXU fill at small Cin); otherwise K shifted
    matmuls are summed (accumulator initialized from the first tap).
    """
    pad = (k - 1) // 2
    shifts = [(pad - t) % L for t in range(k)]
    taps = [_rolled(x, sp, L, Lp, masks) for sp in shifts]
    if merged:
        xs = taps[0] if k == 1 else jnp.concatenate(taps, axis=0)
        return jnp.dot(w, xs.astype(jnp.bfloat16),
                       preferred_element_type=jnp.float32)
    acc = None
    for t in range(k):
        p = jnp.dot(w[t], taps[t].astype(jnp.bfloat16),
                    preferred_element_type=jnp.float32)
        acc = p if acc is None else acc + p
    return acc


def make_layer_kernel(n_res, L, Lp, k0, merged0, kr, mergedr, fuse_head):
    """One fused pallas_call per ResNet layer (one batch sample per grid step):
         conv - [bn-relu-conv-bn-relu-conv (+res)]^m - bn - relu - downsample
    optionally followed by the fc/final 1x1-conv head (fused into last layer).
    All intermediates stay in VMEM/vregs; weights are grid-resident."""
    shift_set = set()
    for k in ([k0] + ([kr] if n_res else [])):
        pad = (k - 1) // 2
        shift_set.update((pad - t) % L for t in range(k))
    shift_set.discard(0)

    def kernel(*refs):
        it = iter(refs)
        x_ref = next(it)
        w0 = next(it)[...]
        blocks = [tuple(next(it)[...] for _ in range(6)) for _ in range(n_res)]
        bn_s = next(it)[...]
        bn_b = next(it)[...]
        dmat = next(it)[...]
        fc_w = fin_w = None
        if fuse_head:
            fc_w = next(it)[...]
            fin_w = next(it)[...]
        o_ref = next(it)

        # Hoisted per-shift lane masks: one iota + one compare per distinct
        # static shift for the whole layer, reused by every conv tap.
        masks = {}
        if Lp != L and shift_set:
            lane = jax.lax.broadcasted_iota(jnp.int32, (1, Lp), 1)
            masks = {sp: lane >= sp for sp in sorted(shift_set)}

        x = x_ref[...].astype(jnp.float32)                     # (Cin, Lp)
        h = _circ_conv(x, w0, k0, merged0, L, Lp, masks)       # (Cout, Lp) f32

        for (s1, b1, w1, s2, b2, w2) in blocks:                # ResBlocks
            t = jnp.maximum(h * s1 + b1, 0.0)                  # bn1 + relu
            t = _circ_conv(t, w1, kr, mergedr, L, Lp, masks)
            t = jnp.maximum(t * s2 + b2, 0.0)                  # bn2 + relu
            t = _circ_conv(t, w2, kr, mergedr, L, Lp, masks)
            h = h + t                                          # residual

        h = jnp.maximum(h * bn_s + bn_b, 0.0)                  # bn + relu
        # Anti-aliased strided downsample: one small per-sample banded matrix,
        # shared across batch / channels / grid steps (resident in VMEM).
        y = jnp.dot(h.astype(jnp.bfloat16), dmat,
                    preferred_element_type=jnp.float32)        # (Cout, Lout_p)

        if fuse_head:                                          # fc + final (1x1 convs)
            y = jnp.maximum(jnp.dot(fc_w, y.astype(jnp.bfloat16),
                                    preferred_element_type=jnp.float32), 0.0)
            y = jnp.dot(fin_w, y.astype(jnp.bfloat16),
                        preferred_element_type=jnp.float32)
        o_ref[...] = y.astype(o_ref.dtype)

    return kernel


# ----------------------------------------------------------------------------
# Anti-aliased downsample as a per-sample banded matrix
# ----------------------------------------------------------------------------
def _fir_kernel(factor, order):
    kern = np.ones(factor)
    box = np.ones(factor)
    for _ in range(order):
        kern = np.convolve(kern, box)
    return kern / kern.sum()


@functools.lru_cache(maxsize=None)
def _downsample_matrix(L, Lp, factor, order):
    """(Lp, Lout_p) matrix equivalent to the anti-aliased depthwise strided conv
    (zero padding, stride `factor`) of one length-L sample.  Zero rows/columns
    keep the lane padding exactly zero at every layer boundary."""
    assert order * (factor - 1) % 2 == 0, "misspecified downsampling parameters"
    kern = _fir_kernel(factor, order)
    klen = len(kern)
    pad = order * (factor - 1) // 2
    Lout = (L + 2 * pad - klen) // factor + 1
    Lout_p = _round_up(Lout, LANE)
    D = np.zeros((Lp, Lout_p), np.float32)
    for i in range(Lout):
        for t in range(klen):
            j = i * factor + t - pad
            if 0 <= j < L:
                D[j, i] = kern[t]
    return jnp.asarray(D, jnp.bfloat16), Lout, Lout_p


# ----------------------------------------------------------------------------
# pallas_call wrapper (one call per layer; head fused into the last layer)
# ----------------------------------------------------------------------------
def layer_forward(x, layer, L, head=None):
    """x: (N, Cin, Lp) bf16 (lanes >= L zero) -> ((N, Cout', Lout_p), Lout, Lout_p)."""
    N, Cin, Lp = x.shape
    conv0 = layer["conv"]
    cout = conv0["cout"]
    n_res = len(layer["blocks"])
    dmat, Lout, Lout_p = _downsample_matrix(L, Lp, layer["downfactor"],
                                            layer["downorder"])

    args = [x, conv0["w"]]
    for blk in layer["blocks"]:
        args += [blk["bn1"][0], blk["bn1"][1], blk["conv1"]["w"],
                 blk["bn2"][0], blk["bn2"][1], blk["conv2"]["w"]]
    args += [layer["bn"][0], layer["bn"][1], dmat]

    out_c, out_dtype = cout, jnp.bfloat16
    if head is not None:
        fc_w, fin_w = head
        args += [fc_w, fin_w]
        out_c, out_dtype = fin_w.shape[0], jnp.float32

    kr = layer["blocks"][0]["conv1"]["k"] if n_res else 1
    mergedr = layer["blocks"][0]["conv1"]["merged"] if n_res else True

    # Activation tiles stream (one sample per grid step, double-buffered);
    # weights / bn / downsample matrix use constant index_maps -> resident.
    in_specs = [pl.BlockSpec((None, Cin, Lp), lambda i: (i, 0, 0))]
    in_specs += [pl.BlockSpec(a.shape, lambda i, nd=a.ndim: (0,) * nd)
                 for a in args[1:]]
    out_specs = pl.BlockSpec((None, out_c, Lout_p), lambda i: (i, 0, 0))

    # Advisory cost estimate + explicit VMEM budget (sized for v7x's 64 MiB).
    itemsize_out = np.dtype(out_dtype).itemsize
    flops = 2 * Lp * conv0["k"] * Cin * cout
    flops += n_res * 2 * (2 * Lp * kr * cout * cout)
    flops += 2 * cout * Lp * Lout_p
    if head is not None:
        flops += 2 * Lout_p * (head[0].shape[0] * head[0].shape[1]
                               + head[1].shape[0] * head[1].shape[1])
    flops *= N
    resident = sum(int(a.size) * a.dtype.itemsize for a in args[1:])
    bytes_accessed = (int(x.size) * x.dtype.itemsize + resident
                      + N * out_c * Lout_p * itemsize_out)
    tile_bytes = 2 * (Cin * Lp * 2 + out_c * Lout_p * itemsize_out)
    work_bytes = 8 * cout * Lp * 4
    vmem_limit = int(min(64 << 20,
                         max(32 << 20, 2 * (resident + tile_bytes + work_bytes))))

    out = pl.pallas_call(
        make_layer_kernel(n_res, L, Lp, conv0["k"], conv0["merged"],
                          kr, mergedr, head is not None),
        out_shape=jax.ShapeDtypeStruct((N, out_c, Lout_p), out_dtype),
        grid=(N,),
        in_specs=in_specs,
        out_specs=out_specs,
        compiler_params=pltpu.CompilerParams(
            dimension_semantics=("parallel",),       # 2-TC batch split on v7x
            vmem_limit_bytes=vmem_limit),
        cost_estimate=pl.CostEstimate(flops=int(flops), transcendentals=0,
                                      bytes_accessed=int(bytes_accessed)),
    )(*args)
    return out, Lout, Lout_p


# ----------------------------------------------------------------------------
# Parameter initialization (deterministic, shapes from the PyTorch __init__)
# ----------------------------------------------------------------------------
def conv_init(key, cout, cin, k):
    """Conv1d weight (PyTorch default init), stored bf16 in the kernel layout:
    merged (Cout, K*Cin) when the taps can be fused into one matmul, else
    per-tap (K, Cout, Cin)."""
    assert k % 2 == 1, "only odd conv kernel sizes supported (as in the module)"
    bound = 1.0 / np.sqrt(cin * k)
    w = jax.random.uniform(key, (cout, cin, k), jnp.float32, -bound, bound)
    merged = (k == 1) or (k * cin <= _MERGE_MAX_DEPTH and cin % _SUBLANE == 0)
    if merged:
        wq = jnp.transpose(w, (0, 2, 1)).reshape(cout, k * cin).astype(jnp.bfloat16)
    else:
        wq = jnp.transpose(w, (2, 0, 1)).astype(jnp.bfloat16)
    return dict(w=wq, k=k, cin=cin, cout=cout, merged=merged)


def dense_init(key, cout, cin):
    bound = 1.0 / np.sqrt(cin)
    w = jax.random.uniform(key, (cout, cin), jnp.float32, -bound, bound)
    return w.astype(jnp.bfloat16)


def bn_init(key, c, eps=1e-5):
    k1, k2, k3, k4 = jax.random.split(key, 4)
    gamma = 1.0 + 0.1 * jax.random.normal(k1, (c,), jnp.float32)
    beta = 0.1 * jax.random.normal(k2, (c,), jnp.float32)
    running_mean = 0.1 * jax.random.normal(k3, (c,), jnp.float32)
    running_var = 1.0 + 0.1 * jax.random.uniform(k4, (c,), jnp.float32)
    scale = gamma / jnp.sqrt(running_var + eps)
    shift = beta - running_mean * scale
    return scale.reshape(c, 1), shift.reshape(c, 1)


def init_resnet_params(key, n_channels, outsize, n_filters_list, kernel_size_list,
                       n_resblocks_list, resblock_kernel_size_list,
                       downfactor_list, downorder_list, fc_size):
    n_layers = len(downfactor_list)
    if isinstance(kernel_size_list, int):
        kernel_size_list = [kernel_size_list] * n_layers
    if isinstance(resblock_kernel_size_list, int):
        resblock_kernel_size_list = [resblock_kernel_size_list] * n_layers
    if isinstance(n_resblocks_list, int):
        n_resblocks_list = [n_resblocks_list] * n_layers

    layers = []
    in_ch = n_channels
    for (out_ch, ks, n_res, res_ks, dfac, dord) in zip(
            n_filters_list, kernel_size_list, n_resblocks_list,
            resblock_kernel_size_list, downfactor_list, downorder_list):
        key, kconv = jax.random.split(key)
        conv_w = conv_init(kconv, out_ch, in_ch, ks)
        blocks = []
        for _ in range(n_res):
            key, ka, kb, kc, kd = jax.random.split(key, 5)
            blocks.append(dict(bn1=bn_init(ka, out_ch),
                               conv1=conv_init(kb, out_ch, out_ch, res_ks),
                               bn2=bn_init(kc, out_ch),
                               conv2=conv_init(kd, out_ch, out_ch, res_ks)))
        key, kbn = jax.random.split(key)
        layers.append(dict(conv=conv_w, blocks=blocks, bn=bn_init(kbn, out_ch),
                           downfactor=dfac, downorder=dord))
        in_ch = out_ch

    key, kfc, kfin = jax.random.split(key, 3)
    fc_w = dense_init(kfc, fc_size, in_ch)        # (fc_size, C_last)
    final_w = dense_init(kfin, outsize, fc_size)  # (outsize, fc_size)
    return dict(layers=layers, fc=fc_w, final=final_w)


# ----------------------------------------------------------------------------
# Forward pass
# ----------------------------------------------------------------------------
def resnet_forward(params, x):
    """x: (N, C, L) float32 -> (N, outsize * L_final) float32 (eval mode)."""
    N, _, L = x.shape
    Lp = _round_up(L, LANE)
    # input Dropout2d -> identity at inference; bf16 inter-layer activations.
    xp = jnp.pad(x.astype(jnp.bfloat16), ((0, 0), (0, 0), (0, Lp - L)))
    layers = params["layers"]
    for li, layer in enumerate(layers):
        head = (params["fc"], params["final"]) if li == len(layers) - 1 else None
        xp, L, Lp = layer_forward(xp, layer, L, head=head)
    outsize = xp.shape[1]
    return xp[:, :, :L].reshape(N, outsize * L)


# ----------------------------------------------------------------------------
# Pure-JAX reference (same bf16-operand / f32-accumulate policy as the kernels)
# ----------------------------------------------------------------------------
def _quant(a):
    return a.astype(jnp.bfloat16).astype(jnp.float32)


def _w_ock(conv):
    """Reconstruct the (Cout, Cin, K) f32 weight from the kernel storage layout."""
    w = conv["w"].astype(jnp.float32)
    k, cin, cout = conv["k"], conv["cin"], conv["cout"]
    if conv["merged"]:
        return jnp.transpose(w.reshape(cout, k, cin), (0, 2, 1))
    return jnp.transpose(w, (1, 2, 0))


def _ref_circ_conv(x, w_ock):
    K = w_ock.shape[-1]
    pad = (K - 1) // 2
    xp = jnp.pad(_quant(x), ((0, 0), (0, 0), (pad, pad)), mode="wrap")
    return jax.lax.conv_general_dilated(
        xp, w_ock, window_strides=(1,), padding="VALID",
        dimension_numbers=("NCH", "OIH", "NCH"))


def _ref_downsample(x, factor, order):
    C = x.shape[1]
    kern = _fir_kernel(factor, order)
    pad = order * (factor - 1) // 2
    w = _quant(jnp.asarray(np.tile(kern[None, None, :], (C, 1, 1)), jnp.float32))
    return jax.lax.conv_general_dilated(
        _quant(x), w, window_strides=(factor,), padding=[(pad, pad)],
        dimension_numbers=("NCH", "OIH", "NCH"), feature_group_count=C)


def resnet_forward_ref(params, x):
    x = x.astype(jnp.float32)
    for layer in params["layers"]:
        x = _ref_circ_conv(x, _w_ock(layer["conv"]))
        for blk in layer["blocks"]:
            s1, b1 = blk["bn1"]
            s2, b2 = blk["bn2"]
            t = jnp.maximum(x * s1 + b1, 0.0)
            t = _ref_circ_conv(t, _w_ock(blk["conv1"]))
            t = jnp.maximum(t * s2 + b2, 0.0)
            t = _ref_circ_conv(t, _w_ock(blk["conv2"]))
            x = x + t
        s, b = layer["bn"]
        x = jnp.maximum(x * s + b, 0.0)
        x = _ref_downsample(x, layer["downfactor"], layer["downorder"])
    fc = params["fc"].astype(jnp.float32)
    fin = params["final"].astype(jnp.float32)
    h = jnp.maximum(jnp.einsum("oc,ncl->nol", fc, _quant(x)), 0.0)
    y = jnp.einsum("oc,ncl->nol", fin, _quant(h))
    return y.reshape(y.shape[0], -1)


if __name__ == "__main__":
    # Small config consistent with the module's constructor.
    batch, n_channels, seq_len = 2, 4, 16
    outsize = 5
    n_filters_list = [8, 16]
    kernel_size_list = 3
    n_resblocks_list = 1
    resblock_kernel_size_list = 3
    downfactor_list = [2, 2]
    downorder_list = [2, 2]          # order*(factor-1) must be even
    fc_size = 32

    key = jax.random.PRNGKey(0)
    key, kparam, kx = jax.random.split(key, 3)
    params = init_resnet_params(kparam, n_channels, outsize, n_filters_list,
                                kernel_size_list, n_resblocks_list,
                                resblock_kernel_size_list, downfactor_list,
                                downorder_list, fc_size)
    x = jax.random.normal(kx, (batch, n_channels, seq_len), jnp.float32)

    fwd = jax.jit(functools.partial(resnet_forward, params))
    y = jax.block_until_ready(fwd(x))

    # Final spatial length: 16 -> 8 -> 4 ; flattened: outsize * 4 = 20
    assert y.shape == (batch, outsize * (seq_len // 4)), y.shape
    assert bool(jnp.all(jnp.isfinite(y)))

    # Numerical check against the pure-JAX reference (same bf16 operand policy).
    y_ref = resnet_forward_ref(params, x)
    err = float(jnp.max(jnp.abs(y - y_ref)))
    scale = float(jnp.max(jnp.abs(y_ref)))
    assert err <= 2e-2 * max(1.0, scale), (err, scale)

    print("KERNEL_OK")
</pallas_src>

<mosaic_0001>
module attributes {stable_mosaic.version = 11 : i64} {
  func.func @kernel(%arg0: i32, %arg1: memref<1x8x128xbf16, #tpu.memory_space<vmem>>, %arg2: memref<16x24xbf16, #tpu.memory_space<vmem>>, %arg3: memref<16x1xf32, #tpu.memory_space<vmem>>, %arg4: memref<16x1xf32, #tpu.memory_space<vmem>>, %arg5: memref<16x48xbf16, #tpu.memory_space<vmem>>, %arg6: memref<16x1xf32, #tpu.memory_space<vmem>>, %arg7: memref<16x1xf32, #tpu.memory_space<vmem>>, %arg8: memref<16x48xbf16, #tpu.memory_space<vmem>>, %arg9: memref<16x1xf32, #tpu.memory_space<vmem>>, %arg10: memref<16x1xf32, #tpu.memory_space<vmem>>, %arg11: memref<128x128xbf16, #tpu.memory_space<vmem>>, %arg12: memref<32x16xbf16, #tpu.memory_space<vmem>>, %arg13: memref<5x32xbf16, #tpu.memory_space<vmem>>, %arg14: memref<1x5x128xf32, #tpu.memory_space<vmem>>) attributes {dimension_semantics = [#tpu.dimension_semantics<parallel>], iteration_bounds = array<i64: 2>, scalar_prefetch = 0 : i64, scratch_operands = 0 : i64, tpu.core_type = #tpu.core_type<tc>, window_params = [{transform_indices = @transform_0, window_bounds = array<i64: 1, 8, 128>}, {pipeline_mode = #tpu.pipeline_mode<synchronous>, transform_indices = @transform_1, window_bounds = array<i64: 16, 24>}, {pipeline_mode = #tpu.pipeline_mode<synchronous>, transform_indices = @transform_2, window_bounds = array<i64: 16, 1>}, {pipeline_mode = #tpu.pipeline_mode<synchronous>, transform_indices = @transform_3, window_bounds = array<i64: 16, 1>}, {pipeline_mode = #tpu.pipeline_mode<synchronous>, transform_indices = @transform_4, window_bounds = array<i64: 16, 48>}, {pipeline_mode = #tpu.pipeline_mode<synchronous>, transform_indices = @transform_5, window_bounds = array<i64: 16, 1>}, {pipeline_mode = #tpu.pipeline_mode<synchronous>, transform_indices = @transform_6, window_bounds = array<i64: 16, 1>}, {pipeline_mode = #tpu.pipeline_mode<synchronous>, transform_indices = @transform_7, window_bounds = array<i64: 16, 48>}, {pipeline_mode = #tpu.pipeline_mode<synchronous>, transform_indices = @transform_8, window_bounds = array<i64: 16, 1>}, {pipeline_mode = #tpu.pipeline_mode<synchronous>, transform_indices = @transform_9, window_bounds = array<i64: 16, 1>}, {pipeline_mode = #tpu.pipeline_mode<synchronous>, transform_indices = @transform_10, window_bounds = array<i64: 128, 128>}, {pipeline_mode = #tpu.pipeline_mode<synchronous>, transform_indices = @transform_11, window_bounds = array<i64: 32, 16>}, {pipeline_mode = #tpu.pipeline_mode<synchronous>, transform_indices = @transform_12, window_bounds = array<i64: 5, 32>}, {transform_indices = @transform_13, window_bounds = array<i64: 1, 5, 128>}]} {
    %c0 = arith.constant 0 : index
    %c0_0 = arith.constant 0 : index
    %0 = vector.load %arg2[%c0, %c0_0] : memref<16x24xbf16, #tpu.memory_space<vmem>>, vector<16x24xbf16>
    %c0_1 = arith.constant 0 : index
    %c0_2 = arith.constant 0 : index
    %1 = vector.load %arg3[%c0_1, %c0_2] : memref<16x1xf32, #tpu.memory_space<vmem>>, vector<16x1xf32>
    %c0_3 = arith.constant 0 : index
    %c0_4 = arith.constant 0 : index
    %2 = vector.load %arg4[%c0_3, %c0_4] : memref<16x1xf32, #tpu.memory_space<vmem>>, vector<16x1xf32>
    %c0_5 = arith.constant 0 : index
    %c0_6 = arith.constant 0 : index
    %3 = vector.load %arg5[%c0_5, %c0_6] : memref<16x48xbf16, #tpu.memory_space<vmem>>, vector<16x48xbf16>
    %c0_7 = arith.constant 0 : index
    %c0_8 = arith.constant 0 : index
    %4 = vector.load %arg6[%c0_7, %c0_8] : memref<16x1xf32, #tpu.memory_space<vmem>>, vector<16x1xf32>
    %c0_9 = arith.constant 0 : index
    %c0_10 = arith.constant 0 : index
    %5 = vector.load %arg7[%c0_9, %c0_10] : memref<16x1xf32, #tpu.memory_space<vmem>>, vector<16x1xf32>
    %c0_11 = arith.constant 0 : index
    %c0_12 = arith.constant 0 : index
    %6 = vector.load %arg8[%c0_11, %c0_12] : memref<16x48xbf16, #tpu.memory_space<vmem>>, vector<16x48xbf16>
    %c0_13 = arith.constant 0 : index
    %c0_14 = arith.constant 0 : index
    %7 = vector.load %arg9[%c0_13, %c0_14] : memref<16x1xf32, #tpu.memory_space<vmem>>, vector<16x1xf32>
    %c0_15 = arith.constant 0 : index
    %c0_16 = arith.constant 0 : index
    %8 = vector.load %arg10[%c0_15, %c0_16] : memref<16x1xf32, #tpu.memory_space<vmem>>, vector<16x1xf32>
    %c0_17 = arith.constant 0 : index
    %c0_18 = arith.constant 0 : index
    %9 = vector.load %arg11[%c0_17, %c0_18] : memref<128x128xbf16, #tpu.memory_space<vmem>>, vector<128x128xbf16>
    %c0_19 = arith.constant 0 : index
    %c0_20 = arith.constant 0 : index
    %10 = vector.load %arg12[%c0_19, %c0_20] : memref<32x16xbf16, #tpu.memory_space<vmem>>, vector<32x16xbf16>
    %c0_21 = arith.constant 0 : index
    %c0_22 = arith.constant 0 : index
    %11 = vector.load %arg13[%c0_21, %c0_22] : memref<5x32xbf16, #tpu.memory_space<vmem>>, vector<5x32xbf16>
    %12 = tpu.iota {dimensions = array<i32: 1>} : vector<1x128xi32>
    %c1_i32 = arith.constant 1 : i32
    %13 = vector.broadcast %c1_i32 : i32 to vector<1x128xi32>
    %14 = arith.cmpi sge, %12, %13 : vector<1x128xi32>
    %c7_i32 = arith.constant 7 : i32
    %15 = vector.broadcast %c7_i32 : i32 to vector<1x128xi32>
    %16 = arith.cmpi sge, %12, %15 : vector<1x128xi32>
    %c0_23 = arith.constant 0 : index
    %c0_24 = arith.constant 0 : index
    %c0_25 = arith.constant 0 : index
    %17 = vector.load %arg1[%c0_23, %c0_24, %c0_25] : memref<1x8x128xbf16, #tpu.memory_space<vmem>>, vector<1x8x128xbf16>
    %18 = vector.shape_cast %17 : vector<1x8x128xbf16> to vector<8x128xbf16>
    %19 = arith.extf %18 : vector<8x128xbf16> to vector<8x128xf32>
    %c1_i32_26 = arith.constant 1 : i32
    %20 = tpu.dynamic_rotate %19 by %c1_i32_26 dim 1 : vector<8x128xf32>, i32 -> vector<8x128xf32>
    %c121_i32 = arith.constant 121 : i32
    %21 = tpu.dynamic_rotate %19 by %c121_i32 dim 1 : vector<8x128xf32>, i32 -> vector<8x128xf32>
    %22 = vector.shape_cast %14 : vector<1x128xi1> to vector<1x128xi1>
    %23 = vector.broadcast %22 : vector<1x128xi1> to vector<8x128xi1>
    %24 = arith.select %23, %20, %21 : vector<8x128xi1>, vector<8x128xf32>
    %c7_i32_27 = arith.constant 7 : i32
    %25 = tpu.dynamic_rotate %19 by %c7_i32_27 dim 1 : vector<8x128xf32>, i32 -> vector<8x128xf32>
    %c127_i32 = arith.constant 127 : i32
    %26 = tpu.dynamic_rotate %19 by %c127_i32 dim 1 : vector<8x128xf32>, i32 -> vector<8x128xf32>
    %27 = vector.shape_cast %16 : vector<1x128xi1> to vector<1x128xi1>
    %28 = vector.broadcast %27 : vector<1x128xi1> to vector<8x128xi1>
    %29 = arith.select %28, %25, %26 : vector<8x128xi1>, vector<8x128xf32>
    %30 = tpu.concatenate %24, %19, %29 in 0 : vector<8x128xf32>, vector<8x128xf32>, vector<8x128xf32> -> vector<24x128xf32>
    %31 = arith.truncf %30 : vector<24x128xf32> to vector<24x128xbf16>
    %cst = arith.constant dense<0.000000e+00> : vector<16x128xf32>
    %32 = tpu.matmul %0, %31, %cst {dimension_numbers = #tpu.dot_dimension_numbers<[1], [0], [0], [1], [0, 0, 1, 1], [], []>} : vector<16x24xbf16>, vector<24x128xbf16>, vector<16x128xf32> -> vector<16x128xf32>
    %33 = vector.broadcast %1 : vector<16x1xf32> to vector<16x128xf32>
    %34 = arith.mulf %32, %33 : vector<16x128xf32>
    %35 = vector.broadcast %2 : vector<16x1xf32> to vector<16x128xf32>
    %36 = arith.addf %34, %35 : vector<16x128xf32>
    %cst_28 = arith.constant 0.000000e+00 : f32
    %37 = vector.broadcast %cst_28 : f32 to vector<16x128xf32>
    %38 = arith.maximumf %36, %37 : vector<16x128xf32>
    %c1_i32_29 = arith.constant 1 : i32
    %39 = tpu.dynamic_rotate %38 by %c1_i32_29 dim 1 : vector<16x128xf32>, i32 -> vector<16x128xf32>
    %c121_i32_30 = arith.constant 121 : i32
    %40 = tpu.dynamic_rotate %38 by %c121_i32_30 dim 1 : vector<16x128xf32>, i32 -> vector<16x128xf32>
    %41 = vector.shape_cast %14 : vector<1x128xi1> to vector<1x128xi1>
    %42 = vector.broadcast %41 : vector<1x128xi1> to vector<16x128xi1>
    %43 = arith.select %42, %39, %40 : vector<16x128xi1>, vector<16x128xf32>
    %c7_i32_31 = arith.constant 7 : i32
    %44 = tpu.dynamic_rotate %38 by %c7_i32_31 dim 1 : vector<16x128xf32>, i32 -> vector<16x128xf32>
    %c127_i32_32 = arith.constant 127 : i32
    %45 = tpu.dynamic_rotate %38 by %c127_i32_32 dim 1 : vector<16x128xf32>, i32 -> vector<16x128xf32>
    %46 = vector.shape_cast %16 : vector<1x128xi1> to vector<1x128xi1>
    %47 = vector.broadcast %46 : vector<1x128xi1> to vector<16x128xi1>
    %48 = arith.select %47, %44, %45 : vector<16x128xi1>, vector<16x128xf32>
    %49 = tpu.concatenate %43, %38, %48 in 0 : vector<16x128xf32>, vector<16x128xf32>, vector<16x128xf32> -> vector<48x128xf32>
    %50 = arith.truncf %49 : vector<48x128xf32> to vector<48x128xbf16>
    %cst_33 = arith.constant dense<0.000000e+00> : vector<16x128xf32>
    %51 = tpu.matmul %3, %50, %cst_33 {dimension_numbers = #tpu.dot_dimension_numbers<[1], [0], [0], [1], [0, 0, 1, 1], [], []>} : vector<16x48xbf16>, vector<48x128xbf16>, vector<16x128xf32> -> vector<16x128xf32>
    %52 = vector.broadcast %4 : vector<16x1xf32> to vector<16x128xf32>
    %53 = arith.mulf %51, %52 : vector<16x128xf32>
    %54 = vector.broadcast %5 : vector<16x1xf32> to vector<16x128xf32>
    %55 = arith.addf %53, %54 : vector<16x128xf32>
    %cst_34 = arith.constant 0.000000e+00 : f32
    %56 = vector.broadcast %cst_34 : f32 to vector<16x128xf32>
    %57 = arith.maximumf %55, %56 : vector<16x128xf32>
    %c1_i32_35 = arith.constant 1 : i32
    %58 = tpu.dynamic_rotate %57 by %c1_i32_35 dim 1 : vector<16x128xf32>, i32 -> vector<16x128xf32>
    %c121_i32_36 = arith.constant 121 : i32
    %59 = tpu.dynamic_rotate %57 by %c121_i32_36 dim 1 : vector<16x128xf32>, i32 -> vector<16x128xf32>
    %60 = vector.shape_cast %14 : vector<1x128xi1> to vector<1x128xi1>
    %61 = vector.broadcast %60 : vector<1x128xi1> to vector<16x128xi1>
    %62 = arith.select %61, %58, %59 : vector<16x128xi1>, vector<16x128xf32>
    %c7_i32_37 = arith.constant 7 : i32
    %63 = tpu.dynamic_rotate %57 by %c7_i32_37 dim 1 : vector<16x128xf32>, i32 -> vector<16x128xf32>
    %c127_i32_38 = arith.constant 127 : i32
    %64 = tpu.dynamic_rotate %57 by %c127_i32_38 dim 1 : vector<16x128xf32>, i32 -> vector<16x128xf32>
    %65 = vector.shape_cast %16 : vector<1x128xi1> to vector<1x128xi1>
    %66 = vector.broadcast %65 : vector<1x128xi1> to vector<16x128xi1>
    %67 = arith.select %66, %63, %64 : vector<16x128xi1>, vector<16x128xf32>
    %68 = tpu.concatenate %62, %57, %67 in 0 : vector<16x128xf32>, vector<16x128xf32>, vector<16x128xf32> -> vector<48x128xf32>
    %69 = arith.truncf %68 : vector<48x128xf32> to vector<48x128xbf16>
    %cst_39 = arith.constant dense<0.000000e+00> : vector<16x128xf32>
    %70 = tpu.matmul %6, %69, %cst_39 {dimension_numbers = #tpu.dot_dimension_numbers<[1], [0], [0], [1], [0, 0, 1, 1], [], []>} : vector<16x48xbf16>, vector<48x128xbf16>, vector<16x128xf32> -> vector<16x128xf32>
    %71 = arith.addf %32, %70 : vector<16x128xf32>
    %72 = vector.broadcast %7 : vector<16x1xf32> to vector<16x128xf32>
    %73 = arith.mulf %71, %72 : vector<16x128xf32>
    %74 = vector.broadcast %8 : vector<16x1xf32> to vector<16x128xf32>
    %75 = arith.addf %73, %74 : vector<16x128xf32>
    %cst_40 = arith.constant 0.000000e+00 : f32
    %76 = vector.broadcast %cst_40 : f32 to vector<16x128xf32>
    %77 = arith.maximumf %75, %76 : vector<16x128xf32>
    %78 = arith.truncf %77 : vector<16x128xf32> to vector<16x128xbf16>
    %cst_41 = arith.constant dense<0.000000e+00> : vector<16x128xf32>
    %79 = tpu.matmul %78, %9, %cst_41 {dimension_numbers = #tpu.dot_dimension_numbers<[1], [0], [0], [1], [0, 0, 1, 1], [], []>} : vector<16x128xbf16>, vector<128x128xbf16>, vector<16x128xf32> -> vector<16x128xf32>
    %80 = arith.truncf %79 : vector<16x128xf32> to vector<16x128xbf16>
    %cst_42 = arith.constant dense<0.000000e+00> : vector<32x128xf32>
    %81 = tpu.matmul %10, %80, %cst_42 {dimension_numbers = #tpu.dot_dimension_numbers<[1], [0], [0], [1], [0, 0, 1, 1], [], []>} : vector<32x16xbf16>, vector<16x128xbf16>, vector<32x128xf32> -> vector<32x128xf32>
    %cst_43 = arith.constant 0.000000e+00 : f32
    %82 = vector.broadcast %cst_43 : f32 to vector<32x128xf32>
    %83 = arith.maximumf %81, %82 : vector<32x128xf32>
    %84 = arith.truncf %83 : vector<32x128xf32> to vector<32x128xbf16>
    %cst_44 = arith.constant dense<0.000000e+00> : vector<5x128xf32>
    %85 = tpu.matmul %11, %84, %cst_44 {dimension_numbers = #tpu.dot_dimension_numbers<[1], [0], [0], [1], [0, 0, 1, 1], [], []>} : vector<5x32xbf16>, vector<32x128xbf16>, vector<5x128xf32> -> vector<5x128xf32>
    %c0_45 = arith.constant 0 : index
    %c0_46 = arith.constant 0 : index
    %c0_47 = arith.constant 0 : index
    %86 = vector.load %arg14[%c0_45, %c0_46, %c0_47] : memref<1x5x128xf32, #tpu.memory_space<vmem>>, vector<1x5x128xf32>
    %87 = vector.shape_cast %86 : vector<1x5x128xf32> to vector<5x128xf32>
    %88 = vector.shape_cast %85 : vector<5x128xf32> to vector<1x5x128xf32>
    tpu.vector_store %arg14[%c0_45, %c0_46, %c0_47], %88 {strides = array<i32>} : memref<1x5x128xf32, #tpu.memory_space<vmem>>, vector<1x5x128xf32>,
    return
  }
  func.func @transform_0(%arg0: i32) -> (i32, i32, i32) {
    %c0_i32 = arith.constant 0 : i32
    %c0_i32_0 = arith.constant 0 : i32
    %c0_i32_1 = arith.constant 0 : i32
    return %arg0, %c0_i32, %c0_i32_0 : i32, i32, i32
  }
  func.func @transform_1(%arg0: i32) -> (i32, i32) {
    %c0_i32 = arith.constant 0 : i32
    %c0_i32_0 = arith.constant 0 : i32
    %c0_i32_1 = arith.constant 0 : i32
    return %c0_i32, %c0_i32_0 : i32, i32
  }
  func.func @transform_2(%arg0: i32) -> (i32, i32) {
    %c0_i32 = arith.constant 0 : i32
    %c0_i32_0 = arith.constant 0 : i32
    %c0_i32_1 = arith.constant 0 : i32
    return %c0_i32, %c0_i32_0 : i32, i32
  }
  func.func @transform_3(%arg0: i32) -> (i32, i32) {
    %c0_i32 = arith.constant 0 : i32
    %c0_i32_0 = arith.constant 0 : i32
    %c0_i32_1 = arith.constant 0 : i32
    return %c0_i32, %c0_i32_0 : i32, i32
  }
  func.func @transform_4(%arg0: i32) -> (i32, i32) {
    %c0_i32 = arith.constant 0 : i32
    %c0_i32_0 = arith.constant 0 : i32
    %c0_i32_1 = arith.constant 0 : i32
    return %c0_i32, %c0_i32_0 : i32, i32
  }
  func.func @transform_5(%arg0: i32) -> (i32, i32) {
    %c0_i32 = arith.constant 0 : i32
    %c0_i32_0 = arith.constant 0 : i32
    %c0_i32_1 = arith.constant 0 : i32
    return %c0_i32, %c0_i32_0 : i32, i32
  }
  func.func @transform_6(%arg0: i32) -> (i32, i32) {
    %c0_i32 = arith.constant 0 : i32
    %c0_i32_0 = arith.constant 0 : i32
    %c0_i32_1 = arith.constant 0 : i32
    return %c0_i32, %c0_i32_0 : i32, i32
  }
  func.func @transform_7(%arg0: i32) -> (i32, i32) {
    %c0_i32 = arith.constant 0 : i32
    %c0_i32_0 = arith.constant 0 : i32
    %c0_i32_1 = arith.constant 0 : i32
    return %c0_i32, %c0_i32_0 : i32, i32
  }
  func.func @transform_8(%arg0: i32) -> (i32, i32) {
    %c0_i32 = arith.constant 0 : i32
    %c0_i32_0 = arith.constant 0 : i32
    %c0_i32_1 = arith.constant 0 : i32
    return %c0_i32, %c0_i32_0 : i32, i32
  }
  func.func @transform_9(%arg0: i32) -> (i32, i32) {
    %c0_i32 = arith.constant 0 : i32
    %c0_i32_0 = arith.constant 0 : i32
    %c0_i32_1 = arith.constant 0 : i32
    return %c0_i32, %c0_i32_0 : i32, i32
  }
  func.func @transform_10(%arg0: i32) -> (i32, i32) {
    %c0_i32 = arith.constant 0 : i32
    %c0_i32_0 = arith.constant 0 : i32
    %c0_i32_1 = arith.constant 0 : i32
    return %c0_i32, %c0_i32_0 : i32, i32
  }
  func.func @transform_11(%arg0: i32) -> (i32, i32) {
    %c0_i32 = arith.constant 0 : i32
    %c0_i32_0 = arith.constant 0 : i32
    %c0_i32_1 = arith.constant 0 : i32
    return %c0_i32, %c0_i32_0 : i32, i32
  }
  func.func @transform_12(%arg0: i32) -> (i32, i32) {
    %c0_i32 = arith.constant 0 : i32
    %c0_i32_0 = arith.constant 0 : i32
    %c0_i32_1 = arith.constant 0 : i32
    return %c0_i32, %c0_i32_0 : i32, i32
  }
  func.func @transform_13(%arg0: i32) -> (i32, i32, i32) {
    %c0_i32 = arith.constant 0 : i32
    %c0_i32_0 = arith.constant 0 : i32
    %c0_i32_1 = arith.constant 0 : i32
    return %arg0, %c0_i32, %c0_i32_0 : i32, i32, i32
  }
}

module attributes {stable_mosaic.version = 11 : i64} {
  func.func @kernel(%arg0: i32, %arg1: memref<1x4x128xbf16, #tpu.memory_space<vmem>>, %arg2: memref<3x8x4xbf16, #tpu.memory_space<vmem>>, %arg3: memref<8x1xf32, #tpu.memory_space<vmem>>, %arg4: memref<8x1xf32, #tpu.memory_space<vmem>>, %arg5: memref<8x24xbf16, #tpu.memory_space<vmem>>, %arg6: memref<8x1xf32, #tpu.memory_space<vmem>>, %arg7: memref<8x1xf32, #tpu.memory_space<vmem>>, %arg8: memref<8x24xbf16, #tpu.memory_space<vmem>>, %arg9: memref<8x1xf32, #tpu.memory_space<vmem>>, %arg10: memref<8x1xf32, #tpu.memory_space<vmem>>, %arg11: memref<128x128xbf16, #tpu.memory_space<vmem>>, %arg12: memref<1x8x128xbf16, #tpu.memory_space<vmem>>) attributes {dimension_semantics = [#tpu.dimension_semantics<parallel>], iteration_bounds = array<i64: 2>, scalar_prefetch = 0 : i64, scratch_operands = 0 : i64, tpu.core_type = #tpu.core_type<tc>, window_params = [{transform_indices = @transform_0, window_bounds = array<i64: 1, 4, 128>}, {pipeline_mode = #tpu.pipeline_mode<synchronous>, transform_indices = @transform_1, window_bounds = array<i64: 3, 8, 4>}, {pipeline_mode = #tpu.pipeline_mode<synchronous>, transform_indices = @transform_2, window_bounds = array<i64: 8, 1>}, {pipeline_mode = #tpu.pipeline_mode<synchronous>, transform_indices = @transform_3, window_bounds = array<i64: 8, 1>}, {pipeline_mode = #tpu.pipeline_mode<synchronous>, transform_indices = @transform_4, window_bounds = array<i64: 8, 24>}, {pipeline_mode = #tpu.pipeline_mode<synchronous>, transform_indices = @transform_5, window_bounds = array<i64: 8, 1>}, {pipeline_mode = #tpu.pipeline_mode<synchronous>, transform_indices = @transform_6, window_bounds = array<i64: 8, 1>}, {pipeline_mode = #tpu.pipeline_mode<synchronous>, transform_indices = @transform_7, window_bounds = array<i64: 8, 24>}, {pipeline_mode = #tpu.pipeline_mode<synchronous>, transform_indices = @transform_8, window_bounds = array<i64: 8, 1>}, {pipeline_mode = #tpu.pipeline_mode<synchronous>, transform_indices = @transform_9, window_bounds = array<i64: 8, 1>}, {pipeline_mode = #tpu.pipeline_mode<synchronous>, transform_indices = @transform_10, window_bounds = array<i64: 128, 128>}, {transform_indices = @transform_11, window_bounds = array<i64: 1, 8, 128>}]} {
    %c0 = arith.constant 0 : index
    %c0_0 = arith.constant 0 : index
    %c0_1 = arith.constant 0 : index
    %0 = vector.load %arg2[%c0, %c0_0, %c0_1] : memref<3x8x4xbf16, #tpu.memory_space<vmem>>, vector<3x8x4xbf16>
    %c0_2 = arith.constant 0 : index
    %c0_3 = arith.constant 0 : index
    %1 = vector.load %arg3[%c0_2, %c0_3] : memref<8x1xf32, #tpu.memory_space<vmem>>, vector<8x1xf32>
    %c0_4 = arith.constant 0 : index
    %c0_5 = arith.constant 0 : index
    %2 = vector.load %arg4[%c0_4, %c0_5] : memref<8x1xf32, #tpu.memory_space<vmem>>, vector<8x1xf32>
    %c0_6 = arith.constant 0 : index
    %c0_7 = arith.constant 0 : index
    %3 = vector.load %arg5[%c0_6, %c0_7] : memref<8x24xbf16, #tpu.memory_space<vmem>>, vector<8x24xbf16>
    %c0_8 = arith.constant 0 : index
    %c0_9 = arith.constant 0 : index
    %4 = vector.load %arg6[%c0_8, %c0_9] : memref<8x1xf32, #tpu.memory_space<vmem>>, vector<8x1xf32>
    %c0_10 = arith.constant 0 : index
    %c0_11 = arith.constant 0 : index
    %5 = vector.load %arg7[%c0_10, %c0_11] : memref<8x1xf32, #tpu.memory_space<vmem>>, vector<8x1xf32>
    %c0_12 = arith.constant 0 : index
    %c0_13 = arith.constant 0 : index
    %6 = vector.load %arg8[%c0_12, %c0_13] : memref<8x24xbf16, #tpu.memory_space<vmem>>, vector<8x24xbf16>
    %c0_14 = arith.constant 0 : index
    %c0_15 = arith.constant 0 : index
    %7 = vector.load %arg9[%c0_14, %c0_15] : memref<8x1xf32, #tpu.memory_space<vmem>>, vector<8x1xf32>
    %c0_16 = arith.constant 0 : index
    %c0_17 = arith.constant 0 : index
    %8 = vector.load %arg10[%c0_16, %c0_17] : memref<8x1xf32, #tpu.memory_space<vmem>>, vector<8x1xf32>
    %c0_18 = arith.constant 0 : index
    %c0_19 = arith.constant 0 : index
    %9 = vector.load %arg11[%c0_18, %c0_19] : memref<128x128xbf16, #tpu.memory_space<vmem>>, vector<128x128xbf16>
    %10 = tpu.iota {dimensions = array<i32: 1>} : vector<1x128xi32>
    %c1_i32 = arith.constant 1 : i32
    %11 = vector.broadcast %c1_i32 : i32 to vector<1x128xi32>
    %12 = arith.cmpi sge, %10, %11 : vector<1x128xi32>
    %c15_i32 = arith.constant 15 : i32
    %13 = vector.broadcast %c15_i32 : i32 to vector<1x128xi32>
    %14 = arith.cmpi sge, %10, %13 : vector<1x128xi32>
    %c0_20 = arith.constant 0 : index
    %c0_21 = arith.constant 0 : index
    %c0_22 = arith.constant 0 : index
    %15 = vector.load %arg1[%c0_20, %c0_21, %c0_22] : memref<1x4x128xbf16, #tpu.memory_space<vmem>>, vector<1x4x128xbf16>
    %16 = vector.shape_cast %15 : vector<1x4x128xbf16> to vector<4x128xbf16>
    %17 = arith.extf %16 : vector<4x128xbf16> to vector<4x128xf32>
    %c1_i32_23 = arith.constant 1 : i32
    %18 = tpu.dynamic_rotate %17 by %c1_i32_23 dim 1 : vector<4x128xf32>, i32 -> vector<4x128xf32>
    %c113_i32 = arith.constant 113 : i32
    %19 = tpu.dynamic_rotate %17 by %c113_i32 dim 1 : vector<4x128xf32>, i32 -> vector<4x128xf32>
    %20 = vector.shape_cast %12 : vector<1x128xi1> to vector<1x128xi1>
    %21 = vector.broadcast %20 : vector<1x128xi1> to vector<4x128xi1>
    %22 = arith.select %21, %18, %19 : vector<4x128xi1>, vector<4x128xf32>
    %c15_i32_24 = arith.constant 15 : i32
    %23 = tpu.dynamic_rotate %17 by %c15_i32_24 dim 1 : vector<4x128xf32>, i32 -> vector<4x128xf32>
    %c127_i32 = arith.constant 127 : i32
    %24 = tpu.dynamic_rotate %17 by %c127_i32 dim 1 : vector<4x128xf32>, i32 -> vector<4x128xf32>
    %25 = vector.shape_cast %14 : vector<1x128xi1> to vector<1x128xi1>
    %26 = vector.broadcast %25 : vector<1x128xi1> to vector<4x128xi1>
    %27 = arith.select %26, %23, %24 : vector<4x128xi1>, vector<4x128xf32>
    %28 = vector.extract_strided_slice %0 {offsets = [0, 0, 0], sizes = [1, 8, 4], strides = [1, 1, 1]} : vector<3x8x4xbf16> to vector<1x8x4xbf16>
    %29 = vector.shape_cast %28 : vector<1x8x4xbf16> to vector<8x4xbf16>
    %30 = arith.truncf %22 : vector<4x128xf32> to vector<4x128xbf16>
    %cst = arith.constant dense<0.000000e+00> : vector<8x128xf32>
    %31 = tpu.matmul %29, %30, %cst {dimension_numbers = #tpu.dot_dimension_numbers<[1], [0], [0], [1], [0, 0, 1, 1], [], []>} : vector<8x4xbf16>, vector<4x128xbf16>, vector<8x128xf32> -> vector<8x128xf32>
    %32 = vector.extract_strided_slice %0 {offsets = [1, 0, 0], sizes = [1, 8, 4], strides = [1, 1, 1]} : vector<3x8x4xbf16> to vector<1x8x4xbf16>
    %33 = vector.shape_cast %32 : vector<1x8x4xbf16> to vector<8x4xbf16>
    %34 = arith.truncf %17 : vector<4x128xf32> to vector<4x128xbf16>
    %cst_25 = arith.constant dense<0.000000e+00> : vector<8x128xf32>
    %35 = tpu.matmul %33, %34, %cst_25 {dimension_numbers = #tpu.dot_dimension_numbers<[1], [0], [0], [1], [0, 0, 1, 1], [], []>} : vector<8x4xbf16>, vector<4x128xbf16>, vector<8x128xf32> -> vector<8x128xf32>
    %36 = arith.addf %31, %35 : vector<8x128xf32>
    %37 = vector.extract_strided_slice %0 {offsets = [2, 0, 0], sizes = [1, 8, 4], strides = [1, 1, 1]} : vector<3x8x4xbf16> to vector<1x8x4xbf16>
    %38 = vector.shape_cast %37 : vector<1x8x4xbf16> to vector<8x4xbf16>
    %39 = arith.truncf %27 : vector<4x128xf32> to vector<4x128xbf16>
    %cst_26 = arith.constant dense<0.000000e+00> : vector<8x128xf32>
    %40 = tpu.matmul %38, %39, %cst_26 {dimension_numbers = #tpu.dot_dimension_numbers<[1], [0], [0], [1], [0, 0, 1, 1], [], []>} : vector<8x4xbf16>, vector<4x128xbf16>, vector<8x128xf32> -> vector<8x128xf32>
    %41 = arith.addf %36, %40 : vector<8x128xf32>
    %42 = vector.broadcast %1 : vector<8x1xf32> to vector<8x128xf32>
    %43 = arith.mulf %41, %42 : vector<8x128xf32>
    %44 = vector.broadcast %2 : vector<8x1xf32> to vector<8x128xf32>
    %45 = arith.addf %43, %44 : vector<8x128xf32>
    %cst_27 = arith.constant 0.000000e+00 : f32
    %46 = vector.broadcast %cst_27 : f32 to vector<8x128xf32>
    %47 = arith.maximumf %45, %46 : vector<8x128xf32>
    %c1_i32_28 = arith.constant 1 : i32
    %48 = tpu.dynamic_rotate %47 by %c1_i32_28 dim 1 : vector<8x128xf32>, i32 -> vector<8x128xf32>
    %c113_i32_29 = arith.constant 113 : i32
    %49 = tpu.dynamic_rotate %47 by %c113_i32_29 dim 1 : vector<8x128xf32>, i32 -> vector<8x128xf32>
    %50 = vector.shape_cast %12 : vector<1x128xi1> to vector<1x128xi1>
    %51 = vector.broadcast %50 : vector<1x128xi1> to vector<8x128xi1>
    %52 = arith.select %51, %48, %49 : vector<8x128xi1>, vector<8x128xf32>
    %c15_i32_30 = arith.constant 15 : i32
    %53 = tpu.dynamic_rotate %47 by %c15_i32_30 dim 1 : vector<8x128xf32>, i32 -> vector<8x128xf32>
    %c127_i32_31 = arith.constant 127 : i32
    %54 = tpu.dynamic_rotate %47 by %c127_i32_31 dim 1 : vector<8x128xf32>, i32 -> vector<8x128xf32>
    %55 = vector.shape_cast %14 : vector<1x128xi1> to vector<1x128xi1>
    %56 = vector.broadcast %55 : vector<1x128xi1> to vector<8x128xi1>
    %57 = arith.select %56, %53, %54 : vector<8x128xi1>, vector<8x128xf32>
    %58 = tpu.concatenate %52, %47, %57 in 0 : vector<8x128xf32>, vector<8x128xf32>, vector<8x128xf32> -> vector<24x128xf32>
    %59 = arith.truncf %58 : vector<24x128xf32> to vector<24x128xbf16>
    %cst_32 = arith.constant dense<0.000000e+00> : vector<8x128xf32>
    %60 = tpu.matmul %3, %59, %cst_32 {dimension_numbers = #tpu.dot_dimension_numbers<[1], [0], [0], [1], [0, 0, 1, 1], [], []>} : vector<8x24xbf16>, vector<24x128xbf16>, vector<8x128xf32> -> vector<8x128xf32>
    %61 = vector.broadcast %4 : vector<8x1xf32> to vector<8x128xf32>
    %62 = arith.mulf %60, %61 : vector<8x128xf32>
    %63 = vector.broadcast %5 : vector<8x1xf32> to vector<8x128xf32>
    %64 = arith.addf %62, %63 : vector<8x128xf32>
    %cst_33 = arith.constant 0.000000e+00 : f32
    %65 = vector.broadcast %cst_33 : f32 to vector<8x128xf32>
    %66 = arith.maximumf %64, %65 : vector<8x128xf32>
    %c1_i32_34 = arith.constant 1 : i32
    %67 = tpu.dynamic_rotate %66 by %c1_i32_34 dim 1 : vector<8x128xf32>, i32 -> vector<8x128xf32>
    %c113_i32_35 = arith.constant 113 : i32
    %68 = tpu.dynamic_rotate %66 by %c113_i32_35 dim 1 : vector<8x128xf32>, i32 -> vector<8x128xf32>
    %69 = vector.shape_cast %12 : vector<1x128xi1> to vector<1x128xi1>
    %70 = vector.broadcast %69 : vector<1x128xi1> to vector<8x128xi1>
    %71 = arith.select %70, %67, %68 : vector<8x128xi1>, vector<8x128xf32>
    %c15_i32_36 = arith.constant 15 : i32
    %72 = tpu.dynamic_rotate %66 by %c15_i32_36 dim 1 : vector<8x128xf32>, i32 -> vector<8x128xf32>
    %c127_i32_37 = arith.constant 127 : i32
    %73 = tpu.dynamic_rotate %66 by %c127_i32_37 dim 1 : vector<8x128xf32>, i32 -> vector<8x128xf32>
    %74 = vector.shape_cast %14 : vector<1x128xi1> to vector<1x128xi1>
    %75 = vector.broadcast %74 : vector<1x128xi1> to vector<8x128xi1>
    %76 = arith.select %75, %72, %73 : vector<8x128xi1>, vector<8x128xf32>
    %77 = tpu.concatenate %71, %66, %76 in 0 : vector<8x128xf32>, vector<8x128xf32>, vector<8x128xf32> -> vector<24x128xf32>
    %78 = arith.truncf %77 : vector<24x128xf32> to vector<24x128xbf16>
    %cst_38 = arith.constant dense<0.000000e+00> : vector<8x128xf32>
    %79 = tpu.matmul %6, %78, %cst_38 {dimension_numbers = #tpu.dot_dimension_numbers<[1], [0], [0], [1], [0, 0, 1, 1], [], []>} : vector<8x24xbf16>, vector<24x128xbf16>, vector<8x128xf32> -> vector<8x128xf32>
    %80 = arith.addf %41, %79 : vector<8x128xf32>
    %81 = vector.broadcast %7 : vector<8x1xf32> to vector<8x128xf32>
    %82 = arith.mulf %80, %81 : vector<8x128xf32>
    %83 = vector.broadcast %8 : vector<8x1xf32> to vector<8x128xf32>
    %84 = arith.addf %82, %83 : vector<8x128xf32>
    %cst_39 = arith.constant 0.000000e+00 : f32
    %85 = vector.broadcast %cst_39 : f32 to vector<8x128xf32>
    %86 = arith.maximumf %84, %85 : vector<8x128xf32>
    %87 = arith.truncf %86 : vector<8x128xf32> to vector<8x128xbf16>
    %cst_40 = arith.constant dense<0.000000e+00> : vector<8x128xf32>
    %88 = tpu.matmul %87, %9, %cst_40 {dimension_numbers = #tpu.dot_dimension_numbers<[1], [0], [0], [1], [0, 0, 1, 1], [], []>} : vector<8x128xbf16>, vector<128x128xbf16>, vector<8x128xf32> -> vector<8x128xf32>
    %89 = arith.truncf %88 : vector<8x128xf32> to vector<8x128xbf16>
    %c0_41 = arith.constant 0 : index
    %c0_42 = arith.constant 0 : index
    %c0_43 = arith.constant 0 : index
    %90 = vector.load %arg12[%c0_41, %c0_42, %c0_43] : memref<1x8x128xbf16, #tpu.memory_space<vmem>>, vector<1x8x128xbf16>
    %91 = vector.shape_cast %90 : vector<1x8x128xbf16> to vector<8x128xbf16>
    %92 = vector.shape_cast %89 : vector<8x128xbf16> to vector<1x8x128xbf16>
    tpu.vector_store %arg12[%c0_41, %c0_42, %c0_43], %92 {strides = array<i32>} : memref<1x8x128xbf16, #tpu.memory_space<vmem>>, vector<1x8x128xbf16>,
    return
  }
  func.func @transform_0(%arg0: i32) -> (i32, i32, i32) {
    %c0_i32 = arith.constant 0 : i32
    %c0_i32_0 = arith.constant 0 : i32
    %c0_i32_1 = arith.constant 0 : i32
    return %arg0, %c0_i32, %c0_i32_0 : i32, i32, i32
  }
  func.func @transform_1(%arg0: i32) -> (i32, i32, i32) {
    %c0_i32 = arith.constant 0 : i32
    %c0_i32_0 = arith.constant 0 : i32
    %c0_i32_1 = arith.constant 0 : i32
    %c0_i32_2 = arith.constant 0 : i32
    return %c0_i32, %c0_i32_0, %c0_i32_1 : i32, i32, i32
  }
  func.func @transform_2(%arg0: i32) -> (i32, i32) {
    %c0_i32 = arith.constant 0 : i32
    %c0_i32_0 = arith.constant 0 : i32
    %c0_i32_1 = arith.constant 0 : i32
    return %c0_i32, %c0_i32_0 : i32, i32
  }
  func.func @transform_3(%arg0: i32) -> (i32, i32) {
    %c0_i32 = arith.constant 0 : i32
    %c0_i32_0 = arith.constant 0 : i32
    %c0_i32_1 = arith.constant 0 : i32
    return %c0_i32, %c0_i32_0 : i32, i32
  }
  func.func @transform_4(%arg0: i32) -> (i32, i32) {
    %c0_i32 = arith.constant 0 : i32
    %c0_i32_0 = arith.constant 0 : i32
    %c0_i32_1 = arith.constant 0 : i32
    return %c0_i32, %c0_i32_0 : i32, i32
  }
  func.func @transform_5(%arg0: i32) -> (i32, i32) {
    %c0_i32 = arith.constant 0 : i32
    %c0_i32_0 = arith.constant 0 : i32
    %c0_i32_1 = arith.constant 0 : i32
    return %c0_i32, %c0_i32_0 : i32, i32
  }
  func.func @transform_6(%arg0: i32) -> (i32, i32) {
    %c0_i32 = arith.constant 0 : i32
    %c0_i32_0 = arith.constant 0 : i32
    %c0_i32_1 = arith.constant 0 : i32
    return %c0_i32, %c0_i32_0 : i32, i32
  }
  func.func @transform_7(%arg0: i32) -> (i32, i32) {
    %c0_i32 = arith.constant 0 : i32
    %c0_i32_0 = arith.constant 0 : i32
    %c0_i32_1 = arith.constant 0 : i32
    return %c0_i32, %c0_i32_0 : i32, i32
  }
  func.func @transform_8(%arg0: i32) -> (i32, i32) {
    %c0_i32 = arith.constant 0 : i32
    %c0_i32_0 = arith.constant 0 : i32
    %c0_i32_1 = arith.constant 0 : i32
    return %c0_i32, %c0_i32_0 : i32, i32
  }
  func.func @transform_9(%arg0: i32) -> (i32, i32) {
    %c0_i32 = arith.constant 0 : i32
    %c0_i32_0 = arith.constant 0 : i32
    %c0_i32_1 = arith.constant 0 : i32
    return %c0_i32, %c0_i32_0 : i32, i32
  }
  func.func @transform_10(%arg0: i32) -> (i32, i32) {
    %c0_i32 = arith.constant 0 : i32
    %c0_i32_0 = arith.constant 0 : i32
    %c0_i32_1 = arith.constant 0 : i32
    return %c0_i32, %c0_i32_0 : i32, i32
  }
  func.func @transform_11(%arg0: i32) -> (i32, i32, i32) {
    %c0_i32 = arith.constant 0 : i32
    %c0_i32_0 = arith.constant 0 : i32
    %c0_i32_1 = arith.constant 0 : i32
    return %arg0, %c0_i32, %c0_i32_0 : i32, i32, i32
  }
}

</mosaic_0001>

<bundles_post_ra>
// kernel: resnet_forward.2
= control target key start
LH: loop header
LB: loop body
LE: loop exit
PB: predicated region body
PF: predicated region fallthrough
CT: control target
= control target key end

     0   :  { %16 = vsyncpa [#allocation3], 0  ;;  %s1596_s0 = inlined_call_operand.vmem [shape: bf16[2,4,128], index: 0, kind: input, shape index: {}]   ;;  %s1597_s1 = inlined_call_operand.vmem [shape: bf16[3,8,4], index: 1, kind: input, shape index: {}]   ;;  %s1598_s2 = inlined_call_operand.hbm [shape: f32[8,1], index: 2, kind: input, shape index: {}]   ;;  %s1599_s3 = inlined_call_operand.hbm [shape: f32[8,1], index: 3, kind: input, shape index: {}]   ;;  %s1600_s4 = inlined_call_operand.hbm [shape: bf16[8,24], index: 4, kind: input, shape index: {}]   ;;  %s1601_s5 = inlined_call_operand.hbm [shape: f32[8,1], index: 5, kind: input, shape index: {}]   ;;  %s1602_s6 = inlined_call_operand.vmem [shape: f32[8,1], index: 6, kind: input, shape index: {}]   ;;  %s1603_s7 = inlined_call_operand.vmem [shape: bf16[8,24], index: 7, kind: input, shape index: {}]   ;;  %s1604_s8 = inlined_call_operand.vmem [shape: f32[8,1], index: 8, kind: input, shape index: {}]   ;;  %s1605_s9 = inlined_call_operand.vmem [shape: f32[8,1], index: 9, kind: input, shape index: {}]   ;;  %s1606_s10 = inlined_call_operand.hbm [shape: bf16[128,128], index: 10, kind: input, shape index: {}]   ;;  %s1607_s11 = inlined_call_operand.vmem [shape: bf16[2,8,128], index: 11, kind: output, shape index: {}]  }
   0x1   :  { %17 = vsyncpa [#allocation5], 0 }
   0x2   :  { %18 = vsyncpa [#allocation8], 0  ;;  %s1399_s17 = smov 0  }
   0x3 LB: > { %s1325_s18 = smov [#allocation4]   ;;  %s1405_s20 = sadd.s32 4294967295, %s1323_s17   ;;  %s1323_s17 = sphi %s1399_s17, %s24_s17  }
   0x4   : > { %s318_s19 = sshll.u32 %s1325_s18, 4  ;;  %p992_p0 = scmp.ge.s32.totalorder %s1323_s17, 1  ;;  %s319_s19 = int_to_ptr.vmem [resolvable:$true] %s318_s19 }
   0x5   : > { %p291_p1 = scmp.lt.s32.totalorder %s1323_s17, 3  ;;  %p1608_p2 = scmp.eq.s32.totalorder %s1405_s20, 0 }
   0x6   : > { %s1326_s22 = smov [#allocation7]   ;;  %s1327_s24 = smov [#allocation2]  }
   0x7   : > { %p1410_p3 = pnand %p992_p0, %p291_p1  ;;  %s340_s23 = sshll.u32 %s1326_s22, 4  ;;  %s341_s23 = int_to_ptr.vmem [resolvable:$true] %s340_s23 }
   0x8   : > { %s307_s25 = sshll.u32 %s1327_s24, 4  ;;  %s1328_s27 = smov [#allocation6]   ;;  %s1422_s25 = int_to_ptr.vmem [resolvable:$true] %s307_s25 }
   0x9   : > { %s1610_s21 = scalar_select %p1410_p3, 1, 0 }
   0xa   : > { %p1117_p4 = pneg %p1410_p3  ;;  %s329_s28 = sshll.u32 %s1328_s27, 4  ;;  %s1424_s28 = int_to_ptr.vmem [resolvable:$true] %s329_s28 }
   0xb   : > { %s1186_s30 = scalar_lea.vmem %s319_s19, 128  ;;  %p1194_p10 = scmp.lt.s32.totalorder %s319_s19, %s319_s19 }
   0xc   : > { %p1418_p5 = pnand %p1608_p2, %p1117_p4  ;;  %p1187_p7 = scmp.ne.s32.totalorder %s319_s19, %s1186_s30 }
   0xd   : > { %p1195_p11 = scmp.lt.s32.totalorder %s1186_s30, %s1186_s30 }
   0xe   : > { %p1428_p6 = pneg %p1418_p5 }
   0xf   : > { %p1196_p12 = por %p1195_p11, %p1194_p10 }
  0x10   : > { %p1189_p8 = pnand %p1187_p7, %p1428_p6 }
  0x12   : > { %p1190_p9 = pneg %p1189_p8 }
  0x14   : > { %p1197_p13 = pnand %p1196_p12, %p1190_p9 }
  0x16   : > { %1200 = shalt.err (!%p1197_p13)
}
  0x17   : > { %1123 = dma.hbm_to_vmem [thread:$0]  (!%p1418_p5), %s1599_s3, 128, %s319_s19, [#allocation5]  }
  0x18   : > { %s1212_s14 = scalar_lea.vmem %s341_s23, 128  ;;  %p1220_p2 = scmp.lt.s32.totalorder %s341_s23, %s341_s23 }
  0x19   : > { %p1213_p0 = scmp.ne.s32.totalorder %s341_s23, %s1212_s14  ;;  %p1221_p7 = scmp.lt.s32.totalorder %s1212_s14, %s1212_s14 }
  0x1b   : > { %p1215_p1 = pnand %p1213_p0, %p1428_p6  ;;  %p1222_p8 = por %p1221_p7, %p1220_p2 }
  0x1d   : > { %p1216_p4 = pneg %p1215_p1 }
  0x1f   : > { %p1223_p3 = pnand %p1222_p8, %p1216_p4 }
  0x21   : > { %1226 = shalt.err (!%p1223_p3)
}
  0x22   : > { %1129 = dma.hbm_to_vmem [thread:$0]  (!%p1418_p5), %s1601_s5, 128, %s341_s23, [#allocation8]  }
  0x23   : > { %s1238_s18 = scalar_lea.vmem %s1422_s25, 128  ;;  %p1246_p12 = scmp.lt.s32.totalorder %s1422_s25, %s1422_s25 }
  0x24   : > { %p1239_p9 = scmp.ne.s32.totalorder %s1422_s25, %s1238_s18  ;;  %p1247_p2 = scmp.lt.s32.totalorder %s1238_s18, %s1238_s18 }
  0x26   : > { %p1241_p10 = pnand %p1239_p9, %p1428_p6  ;;  %p1248_p13 = por %p1247_p2, %p1246_p12 }
  0x28   : > { %p1242_p11 = pneg %p1241_p10 }
  0x2a   : > { %p1249_p3 = pnand %p1248_p13, %p1242_p11 }
  0x2c   : > { %1252 = shalt.err (!%p1249_p3)
}
  0x2d   : > { %1120 = dma.hbm_to_vmem [thread:$0]  (!%p1418_p5), %s1598_s2, 128, %s1422_s25, [#allocation3]  }
  0x2e   : > { %s1264_s23 = scalar_lea.vmem %s1424_s28, 64  ;;  %p1272_p7 = scmp.lt.s32.totalorder %s1424_s28, %s1424_s28 }
  0x2f   : > { %p1265_p0 = scmp.ne.s32.totalorder %s1424_s28, %s1264_s23  ;;  %p1273_p8 = scmp.lt.s32.totalorder %s1264_s23, %s1264_s23 }
  0x31   : > { %p1267_p1 = pnand %p1265_p0, %p1428_p6  ;;  %p1274_p9 = por %p1273_p8, %p1272_p7 }
  0x33   : > { %p1268_p4 = pneg %p1267_p1 }
  0x35   : > { %p1275_p10 = pnand %p1274_p9, %p1268_p4 }
  0x37   : > { %1278 = shalt.err (!%p1275_p10)
}
  0x38   : > { %1126 = dma.hbm_to_vmem [thread:$0]  (!%p1418_p5), %s1600_s4, 64, %s1424_s28, [#allocation5]  }
  0x39   : > { %s1329_s25 = smov [#allocation9]  }
  0x3a   : > { %s362_s30 = sshll.u32 %s1329_s25, 4  ;;  %s363_s30 = int_to_ptr.vmem [resolvable:$true] %s362_s30 }
  0x3b   : > { %s1290_s12 = scalar_lea.vmem %s363_s30, 1024  ;;  %p1298_p13 = scmp.lt.s32.totalorder %s363_s30, %s363_s30 }
  0x3c   : > { %p1291_p11 = scmp.ne.s32.totalorder %s363_s30, %s1290_s12  ;;  %p1299_p3 = scmp.lt.s32.totalorder %s1290_s12, %s1290_s12 }
  0x3e   : > { %p1293_p12 = pnand %p1291_p11, %p1428_p6  ;;  %p1300_p0 = por %p1299_p3, %p1298_p13 }
  0x40   : > { %p1294_p2 = pneg %p1293_p12 }
  0x42   : > { %p1301_p1 = pnand %p1300_p0, %p1294_p2 }
  0x44   : > { %1304 = shalt.err (!%p1301_p1)
}
  0x45   : > { %s1330_s13 = smov 64   ;;  %s1331_s14 = smov 4  }
  0x46   : > { %1132 = dma.hbm_to_vmem [thread:$0]  (!%p1418_p5), %s1606_s10, 1024, %s363_s30, [#allocation8], %s1330_s13, %s1330_s13, %s1331_s14  }
  0x47   : > { %p1613_p4 = scmp.ne.s32.totalorder %s1610_s21, 0 }
  0x48   : > { %p1614_p7 = scmp.eq.s32.totalorder (!%p1613_p4), %s1405_s20, 0 }
  0x49   : > { %385 = sbr.rel (%p1613_p4) target bundleno = 1276 (0x4fc), region = 64 }
  0x4e   : > { %1310 = dma.done.wait (%p1614_p7), [#allocation3], 128   ;;  %p1615_p6 = pmov %p1614_p7 }
  0x50   : > { %1312 = vsyncadd (%p1615_p6), [#allocation3], 4294967168  ;;  %p1616_p8 = pmov %p1615_p6 }
  0x51   : > { %p1617_p9 = pmov %p1615_p6 }
  0x52   : > { %1314 = dma.done.wait (%p1616_p8), [#allocation5], 192  }
  0x53   : > { %1316 = vsyncadd (%p1617_p9), [#allocation5], 4294967104  ;;  %p1618_p10 = pmov %p1615_p6 }
  0x54   : > { %p1619_p5 = pmov %p1615_p6 }
  0x55   : > { %1318 = dma.done.wait (%p1618_p10), [#allocation8], 1152  }
  0x56   : > { %1320 = vsyncadd (%p1619_p5), [#allocation8], 4294966144  ;;  %p439_p11 = scmp.lt.s32.totalorder %s1405_s20, 1  ;;  %v1332_v0 = vmov 0.0   ;;  %vm1333_vm0 = vmmov 0   ;;  %vm500_vm1 = vcmask 1041408   ;;  %v475_v8 = vlaneseq }
  0x57   : > { %1043 = vmatprep.subr.bf16.mxu0 %v1332_v0  ;;  %1049 = vmatprep.subr.bf16.mxu1 %v1332_v0  ;;  %v449_v4 = vld [vmem:[%s1597_s1 + $0x4] sm:$0xf]  ;;  %vm496_vm2 = vcmask 31744   ;;  %v1334_v5 = vmov 0   ;;  %s1335_s22 = smov 15   ;;  %s1336_s23 = smov 1  }
  0x58   : > { %s1621_s20 = smov (!%p439_p11, %s1405_s20), 1  ;;  %1045 = vmatprep.mubr.msk.bf16.mxu0 %vm1333_vm0, %v1332_v0  ;;  %1051 = vmatprep.mubr.msk.bf16.mxu1 %vm1333_vm0, %v1332_v0  ;;  %s1337_s24 = smov 127   ;;  %v451_v6 = vld [vmem:[#allocation2] sm:$0xff]  ;;  %v452_v7 = vld [vmem:[#allocation4] sm:$0xff]  ;;  %v1517_v9 = vand.u32 127, %v475_v8  ;;  %v454_v42 = vld [vmem:[#allocation7] sm:$0xff] }
  0x59   : > { %s1005_s21 = sshll.u32 %s1621_s20, 1  ;;  %1165 = vset.pattern.permute.xlu0 %v1334_v5  ;;  %1166 = vset.pattern.permute.xlu1 %v1334_v5  ;;  %s1338_s27 = smov 113   ;;  %v448_v20 = vld [vmem:[%s1597_s1] sm:$0xf]  ;;  %v450_v21 = vld [vmem:[%s1597_s1 + $0x8] sm:$0xf] }
  0x5a   : > { %s442_s29 = scalar_lea.vmem %s1596_s0, %s1005_s21  ;;  %vm478_vm3 = vcmp.ge.s32.totalorder %v1517_v9, 15  ;;  %vm477_vm4 = vcmp.ge.s32.totalorder %v1517_v9, 1  ;;  %v455_v41 = vld [vmem:[%s1602_s6] sm:$0xff]  ;;  %vm667_vm5 = vcmask 1043456   ;;  %v453_v52 = vld [vmem:[#allocation6] sm:$0xf] }
  0x5b   : > { %v479_v1 = vld [vmem:[%s442_s29] sm:$0x3]  ;;  %vm663_vm6 = vcmask 195584   ;;  %v1167_v62 = vld [vmem:[#allocation9 + $0x38] sm:$0xff]   ;;  %s1006_s19 = sshll.u32 %s1621_s20, 2 }
  0x5c   : > { %v480_v2 = vunpack.c.l.bf16 %v479_v1  ;;  %v502_v3 = vsel %vm500_vm1, %v479_v1, 0  ;;  %v458_v63 = vld [vmem:[%s1605_s9] sm:$0xff]  ;;  %v1171_v5 = vld [vmem:[#allocation9 + $0x18] sm:$0xff]  }
  0x5d   : > { %1044 = vmatpush3.bf16.msra.mxu0 %v502_v3  ;;  %v457_v1 = vld [vmem:[%s1604_s8] sm:$0xff] }
  0x5e   : > { %488 = vrot.lane.b32.xlu1 %v480_v2, %s1335_s22  ;;  %481 = vrot.lane.b32.xlu0 %v480_v2, %s1336_s23  ;;  %v1169_v3 = vld [vmem:[#allocation9 + $0x28] sm:$0xff]   ;;  %v1174_v9 = vld [vmem:[#allocation9] sm:$0xff]  }
  0x5f   : > { %1055 = vmatprep.subr.bf16.mxu0 %v1332_v0 }
  0x60   : > { %1046 = vmatmul.mubr.msk.bf16.vlgmr.msra.gmra.mxu0 %vm496_vm2, %v449_v4  ;;  %v1170_v4 = vld [vmem:[#allocation9 + $0x20] sm:$0xff]  }
  0x61   : > { %1057 = vmatprep.mubr.msk.bf16.mxu0 %vm1333_vm0, %v1332_v0 }
  0x62   : > { %490 = vrot.lane.b32.xlu1 %v480_v2, %s1337_s24  ;;  %483 = vrot.lane.b32.xlu0 %v480_v2, %s1338_s27  ;;  %v1168_v2 = vld [vmem:[#allocation9 + $0x30] sm:$0xff]  }
  0x66   : > { %640 = vperm.xlu0 %1165, %v451_v6   ;;  %646 = vperm.xlu1 %1166, %v452_v7  }
  0xd0   : > { %v489_v10 = vpop.permute.xlu1 %488  ;;  %v482_v11 = vpop.permute.xlu0 %481 }
  0xd4   : > { %v491_v12 = vpop.permute.xlu1 %490  ;;  %v484_v13 = vpop.permute.xlu0 %483 }
  0xd5   : > { %v494_v14 = vsel %vm478_vm3, %v489_v10, %v491_v12  ;;  %v487_v15 = vsel %vm477_vm4, %v482_v11, %v484_v13 }
  0xd6   : > { %v590_v16 = vpack.c.bf16 %v494_v14, %v494_v14  ;;  %v495_v17 = vpack.c.bf16 %v487_v15, %v487_v15 }
  0xd8   : > { %v548_v18 = vsel %vm500_vm1, %v495_v17, 0  ;;  %v595_v19 = vsel %vm500_vm1, %v590_v16, 0  ;;  %v456_v16 = vld [vmem:[%s1603_s7] sm:$0xf]  ;;  %v1172_v17 = vld [vmem:[#allocation9 + $0x10] sm:$0xff]  }
  0xd9   : > { %1050 = vmatpush3.bf16.msra.mxu1 %v548_v18  ;;  %1056 = vmatpush3.bf16.msra.mxu0 %v595_v19  ;;  %v1173_v18 = vld [vmem:[#allocation9 + $0x8] sm:$0xff]  }
  0xda   : > { %1061 = vmatprep.subr.bf16.mxu0 %v1332_v0  ;;  %1077 = vmatprep.subr.bf16.mxu1 %v1332_v0 }
  0xdc   : > { %1052 = vmatmul.mubr.msk.bf16.vlgmr.msra.gmra.mxu1 %vm496_vm2, %v448_v20  ;;  %1058 = vmatmul.mubr.msk.bf16.vlgmr.msra.gmra.mxu0 %vm496_vm2, %v450_v21 }
  0xdd   : > { %1065 = vmatprep.mubr.msk.bf16.mxu0 %vm1333_vm0, %v1332_v0  ;;  %1093 = vmatprep.mubr.msk.bf16.mxu1 %vm1333_vm0, %v1332_v0 }
  0xde   : > { %1078 = vmatpush3.bf16.msra.mxu1 %v1167_v62 }
  0xdf   : > { %1079 = vmatprep.subr.bf16.mxu1 %v1332_v0 }
  0xe1   : > { %v641_v29 = vpop.permute.xlu0 %640  ;;  %v647_v33 = vpop.permute.xlu1 %646 }
  0xe2   : > { %1080 = vmatpush3.bf16.msra.mxu1 %v1168_v2 }
  0xe3   : > { %1081 = vmatprep.subr.bf16.mxu1 %v1332_v0 }
  0xe6   : > { %1082 = vmatpush3.bf16.msra.mxu1 %v1169_v3 }
  0xe7   : > { %1083 = vmatprep.subr.bf16.mxu1 %v1332_v0 }
  0xea   : > { %1084 = vmatpush3.bf16.msra.mxu1 %v1170_v4 }
  0xeb   : > { %1085 = vmatprep.subr.bf16.mxu1 %v1332_v0 }
  0xee   : > { %1086 = vmatpush3.bf16.msra.mxu1 %v1171_v5 }
  0xef   : > { %1087 = vmatprep.subr.bf16.mxu1 %v1332_v0 }
  0xf2   : > { %1088 = vmatpush3.bf16.msra.mxu1 %v1172_v17 }
  0xf3   : > { %1089 = vmatprep.subr.bf16.mxu1 %v1332_v0 }
  0xf6   : > { %1090 = vmatpush3.bf16.msra.mxu1 %v1173_v18 }
  0xf7   : > { %1091 = vmatprep.subr.bf16.mxu1 %v1332_v0 }
  0xfa   : > { %1092 = vmatpush3.bf16.msra.mxu1 %v1174_v9 }
 0x120   : > { %v538_v22 = vpop.f32.mrf.mxu0 }
 0x122   : > { %v1047_v23 = vpop.f32.mrf.mxu0 }
 0x124   : > { %v541_v24 = vpop.f32.mrf.mxu0 }
 0x126   : > { %v1048_v25 = vpop.f32.mrf.mxu0 }
 0x19c   : > { %v584_v26 = vpop.f32.mrf.mxu1  ;;  %v631_v27 = vpop.f32.mrf.mxu0 }
 0x19d   : > { %v585_v28 = vadd.f32 %v584_v26, %v538_v22 }
 0x19e   : > { %v1053_v30 = vpop.f32.mrf.mxu1  ;;  %v1059_v31 = vpop.f32.mrf.mxu0 }
 0x19f   : > { %v1541_v32 = vadd.f32 %v631_v27, %v585_v28 }
 0x1a0   : > { %v587_v34 = vpop.f32.mrf.mxu1  ;;  %v634_v35 = vpop.f32.mrf.mxu0 }
 0x1a1   : > { %v643_v36 = vmul.f32 %v641_v29, %v1541_v32 }
 0x1a2   : > { %v1054_v37 = vpop.f32.mrf.mxu1  ;;  %v1060_v38 = vpop.f32.mrf.mxu0 }
 0x1a3   : > { %v649_v39 = vadd.f32 %v647_v33, %v643_v36 }
 0x1a5   : > { %v650_v40 = vmax.f32 %v649_v39, 0.0 }
 0x1a7   : > { %658 = vrot.lane.b32.xlu0 %v650_v40, %s1337_s24  ;;  %656 = vrot.lane.b32.xlu1 %v650_v40, %s1335_s22 }
 0x1ab   : > { %653 = vrot.lane.b32.xlu0 %v650_v40, %s1338_s27  ;;  %651 = vrot.lane.b32.xlu1 %v650_v40, %s1336_s23 }
 0x1af   : > { %719 = vperm.xlu0 %1165, %v455_v41   ;;  %713 = vperm.xlu1 %1166, %v454_v42  }
 0x219   : > { %v659_v43 = vpop.permute.xlu0 %658  ;;  %v657_v44 = vpop.permute.xlu1 %656 }
 0x21a   : > { %v660_v45 = vsel %vm478_vm3, %v657_v44, %v659_v43 }
 0x21b   : > { %v662_v46 = vpack.c.bf16 %v660_v45, %v660_v45 }
 0x21d   : > { %v654_v47 = vpop.permute.xlu0 %653  ;;  %v652_v48 = vpop.permute.xlu1 %651  ;;  %v669_v49 = vsel %vm667_vm5, %v662_v46, 0 }
 0x21e   : > { %v655_v50 = vsel %vm477_vm4, %v652_v48, %v654_v47  ;;  %1062 = vmatpush3.bf16.msra.mxu0 %v669_v49 }
 0x21f   : > { %v661_v51 = vpack.c.bf16 %v650_v40, %v655_v50  ;;  %1063 = vmatprep.subr.bf16.mxu0 %v1332_v0 }
 0x222   : > { %1064 = vmatpush3.bf16.msra.mxu0 %v661_v51 }
 0x223   : > { %1069 = vmatprep.subr.bf16.mxu0 %v1332_v0 }
 0x225   : > { %1066 = vmatmul.mubr.msk.bf16.vlgmr.msra.gmra.mxu0 %vm663_vm6, %v453_v52 }
 0x226   : > { %1073 = vmatprep.mubr.msk.bf16.mxu0 %vm1333_vm0, %v1332_v0 }
 0x22a   : > { %v714_v53 = vpop.permute.xlu1 %713  ;;  %v720_v56 = vpop.permute.xlu0 %719 }
 0x2e5   : > { %v705_v54 = vpop.f32.mrf.mxu0 }
 0x2e6   : > { %v716_v55 = vmul.f32 %v714_v53, %v705_v54 }
 0x2e7   : > { %v1067_v57 = vpop.f32.mrf.mxu0 }
 0x2e8   : > { %v722_v58 = vadd.f32 %v720_v56, %v716_v55 }
 0x2e9   : > { %v708_v59 = vpop.f32.mrf.mxu0 }
 0x2ea   : > { %v723_v60 = vmax.f32 %v722_v58, 0.0 }
 0x2eb   : > { %v1068_v61 = vpop.f32.mrf.mxu0 }
 0x2ec   : > { %731 = vrot.lane.b32.xlu0 %v723_v60, %s1337_s24  ;;  %729 = vrot.lane.b32.xlu1 %v723_v60, %s1335_s22  ;;  %s446_s24 = scalar_lea.vmem %s1607_s11, %s1006_s19 }
 0x2f0   : > { %726 = vrot.lane.b32.xlu0 %v723_v60, %s1338_s27  ;;  %724 = vrot.lane.b32.xlu1 %v723_v60, %s1336_s23 }
 0x2f4   : > { %791 = vperm.xlu0 %1165, %v458_v63   ;;  %785 = vperm.xlu1 %1166, %v457_v1  }
 0x35e   : > { %v732_v6 = vpop.permute.xlu0 %731  ;;  %v730_v7 = vpop.permute.xlu1 %729 }
 0x35f   : > { %v733_v8 = vsel %vm478_vm3, %v730_v7, %v732_v6 }
 0x360   : > { %v735_v10 = vpack.c.bf16 %v733_v8, %v733_v8 }
 0x362   : > { %v727_v11 = vpop.permute.xlu0 %726  ;;  %v725_v12 = vpop.permute.xlu1 %724  ;;  %v740_v13 = vsel %vm667_vm5, %v735_v10, 0 }
 0x363   : > { %v728_v14 = vsel %vm477_vm4, %v725_v12, %v727_v11  ;;  %1070 = vmatpush3.bf16.msra.mxu0 %v740_v13 }
 0x364   : > { %v734_v15 = vpack.c.bf16 %v723_v60, %v728_v14  ;;  %1071 = vmatprep.subr.bf16.mxu0 %v1332_v0 }
 0x367   : > { %1072 = vmatpush3.bf16.msra.mxu0 %v734_v15 }
 0x36a   : > { %1074 = vmatmul.mubr.msk.bf16.vlgmr.msra.gmra.mxu0 %vm663_vm6, %v456_v16 }
 0x36f   : > { %v786_v21 = vpop.permute.xlu1 %785  ;;  %v792_v24 = vpop.permute.xlu0 %791 }
 0x42a   : > { %v776_v19 = vpop.f32.mrf.mxu0 }
 0x42b   : > { %v782_v20 = vadd.f32 %v776_v19, %v1541_v32 }
 0x42c   : > { %v1075_v22 = vpop.f32.mrf.mxu0 }
 0x42d   : > { %v788_v23 = vmul.f32 %v786_v21, %v782_v20 }
 0x42e   : > { %v779_v25 = vpop.f32.mrf.mxu0 }
 0x42f   : > { %v794_v26 = vadd.f32 %v792_v24, %v788_v23 }
 0x430   : > { %v1076_v27 = vpop.f32.mrf.mxu0 }
 0x431   : > { %v795_v28 = vmax.f32 %v794_v26, 0.0 }
 0x433   : > { %v796_v29 = vpack.c.bf16 %v795_v28, %v795_v28 }
 0x435   : > { %1094 = vmatmul.mubr.bf16.vlgmr.msra.gmra.mxu1 %v796_v29 }
 0x4f5   : > { %v879_v0 = vpop.f32.mrf.mxu1 }
 0x4f6   : > { %v885_v30 = vpack.c.bf16 %v879_v0, %v879_v0 }
 0x4f7   : > { %v1095_v31 = vpop.f32.mrf.mxu1 }
 0x4f8   : > { %886 = vst [vmem:[%s446_s24] sm:$0xf] %v885_v30 }
 0x4f9   : > { %v882_v32 = vpop.f32.mrf.mxu1 }
 0x4fb   : > { %v1096_v33 = vpop.f32.mrf.mxu1 }
 0x4fc PF: > { %s24_s17 = sadd.s32 1, %s1323_s17  }
 0x4fd   : > { %p21_p12 = scmp.ge.s32.totalorder %s24_s17, 4  }
 0x4ff   :  { %23 = sbr.rel (!%p21_p12) target bundleno = 3 (0x3), region = 115 }
 0x504   :  { %906 = vsyncpa [#allocation3], 1 }
 0x505   :  { %908 = vsyncpa [#allocation3 + $0x1], 1 }
 0x506   :  { %909 = vsyncpa [#allocation5], 1 }
 0x507   :  { %910 = vsyncpa [#allocation8], 1 }

// kernel: resnet_forward.3
= control target key start
LH: loop header
LB: loop body
LE: loop exit
PB: predicated region body
PF: predicated region fallthrough
CT: control target
= control target key end

     0   :  { %18 = vsyncpa [#allocation3], 0  ;;  %s1896_s0 = inlined_call_operand.vmem [shape: bf16[2,8,128], index: 0, kind: input, shape index: {}]   ;;  %s1897_s1 = inlined_call_operand.hbm [shape: bf16[16,24], index: 1, kind: input, shape index: {}]   ;;  %s1898_s2 = inlined_call_operand.hbm [shape: f32[16,1], index: 2, kind: input, shape index: {}]   ;;  %s1899_s3 = inlined_call_operand.vmem [shape: f32[16,1], index: 3, kind: input, shape index: {}]   ;;  %s1900_s4 = inlined_call_operand.hbm [shape: bf16[16,48], index: 4, kind: input, shape index: {}]   ;;  %s1901_s5 = inlined_call_operand.vmem [shape: f32[16,1], index: 5, kind: input, shape index: {}]   ;;  %s1902_s6 = inlined_call_operand.vmem [shape: f32[16,1], index: 6, kind: input, shape index: {}]   ;;  %s1903_s7 = inlined_call_operand.hbm [shape: bf16[16,48], index: 7, kind: input, shape index: {}]   ;;  %s1904_s8 = inlined_call_operand.vmem [shape: f32[16,1], index: 8, kind: input, shape index: {}]   ;;  %s1905_s9 = inlined_call_operand.vmem [shape: f32[16,1], index: 9, kind: input, shape index: {}]   ;;  %s1906_s10 = inlined_call_operand.vmem [shape: bf16[128,128], index: 10, kind: input, shape index: {}]   ;;  %s1907_s11 = inlined_call_operand.vmem [shape: bf16[32,16], index: 11, kind: input, shape index: {}]   ;;  %s1908_s12 = inlined_call_operand.hbm [shape: bf16[5,32], index: 12, kind: input, shape index: {}]   ;;  %s1909_s13 = inlined_call_operand.vmem [shape: f32[2,5,128], index: 13, kind: output, shape index: {}]  }
   0x1   :  { %19 = vsyncpa [#allocation5], 0 }
   0x2   :  { %20 = vsyncpa [#allocation8], 0  ;;  %s1646_s25 = smov 0  }
   0x3 LB: > { %s1560_s26 = smov [#allocation4]   ;;  %s1652_s28 = sadd.s32 4294967295, %s1558_s25   ;;  %s1558_s25 = sphi %s1646_s25, %s26_s25  }
   0x4   : > { %s360_s27 = sshll.u32 %s1560_s26, 4  ;;  %p1161_p0 = scmp.ge.s32.totalorder %s1558_s25, 1  ;;  %s361_s27 = int_to_ptr.vmem [resolvable:$true] %s360_s27 }
   0x5   : > { %p335_p1 = scmp.lt.s32.totalorder %s1558_s25, 3  ;;  %p1321_p2 = scmp.eq.s32.totalorder %s1652_s28, 0 }
   0x6   : > { %s1561_s14 = smov [#allocation7]   ;;  %s1562_s16 = smov [#allocation2]  }
   0x7   : > { %p1657_p3 = pnand %p1161_p0, %p335_p1  ;;  %s395_s15 = sshll.u32 %s1561_s14, 4  ;;  %s1669_s15 = int_to_ptr.vmem [resolvable:$true] %s395_s15 }
   0x8   : > { %s347_s17 = sshll.u32 %s1562_s16, 4  ;;  %s1421_s19 = scalar_lea.vmem %s361_s27, 256  ;;  %s1671_s17 = int_to_ptr.vmem [resolvable:$true] %s347_s17 }
   0x9   : > { %p1305_p4 = pneg %p1657_p3  ;;  %p1422_p7 = scmp.ne.s32.totalorder %s361_s27, %s1421_s19 }
   0xa   : > { %p1429_p10 = scmp.lt.s32.totalorder %s361_s27, %s361_s27  ;;  %p1430_p11 = scmp.lt.s32.totalorder %s1421_s19, %s1421_s19 }
   0xb   : > { %p1665_p5 = pnand %p1321_p2, %p1305_p4 }
   0xc   : > { %p1431_p12 = por %p1430_p11, %p1429_p10 }
   0xd   : > { %p1675_p6 = pneg %p1665_p5 }
   0xf   : > { %p1424_p8 = pnand %p1422_p7, %p1675_p6 }
  0x11   : > { %p1425_p9 = pneg %p1424_p8 }
  0x13   : > { %p1432_p13 = pnand %p1431_p12, %p1425_p9 }
  0x15   : > { %1435 = shalt.err (!%p1432_p13)
}
  0x16   : > { %s1563_s20 = smov 128   ;;  %s1564_s21 = smov 8  }
  0x17   : > { %1311 = dma.hbm_to_vmem [thread:$0]  (!%p1665_p5), %s1898_s2, 256, %s361_s27, [#allocation5], %s1563_s20, %s1563_s20, %s1564_s21  }
  0x18   : > { %s1447_s24 = scalar_lea.vmem %s1669_s15, 128  ;;  %p1455_p7 = scmp.lt.s32.totalorder %s1669_s15, %s1669_s15 }
  0x19   : > { %p1448_p0 = scmp.ne.s32.totalorder %s1669_s15, %s1447_s24  ;;  %p1456_p8 = scmp.lt.s32.totalorder %s1447_s24, %s1447_s24 }
  0x1b   : > { %p1450_p1 = pnand %p1448_p0, %p1675_p6  ;;  %p1457_p9 = por %p1456_p8, %p1455_p7 }
  0x1d   : > { %p1451_p4 = pneg %p1450_p1 }
  0x1f   : > { %p1458_p10 = pnand %p1457_p9, %p1451_p4 }
  0x21   : > { %1461 = shalt.err (!%p1458_p10)
}
  0x22   : > { %s1565_s26 = smov 64   ;;  %s1566_s14 = smov 4  }
  0x23   : > { %1317 = dma.hbm_to_vmem [thread:$0]  (!%p1665_p5), %s1903_s7, 128, %s1669_s15, [#allocation8], %s1565_s26, %s1565_s26, %s1566_s14  }
  0x24   : > { %s1473_s19 = scalar_lea.vmem %s1671_s17, 128  ;;  %p1481_p0 = scmp.lt.s32.totalorder %s1671_s17, %s1671_s17 }
  0x25   : > { %p1474_p11 = scmp.ne.s32.totalorder %s1671_s17, %s1473_s19  ;;  %p1482_p1 = scmp.lt.s32.totalorder %s1473_s19, %s1473_s19 }
  0x27   : > { %p1476_p12 = pnand %p1474_p11, %p1675_p6  ;;  %p1483_p4 = por %p1482_p1, %p1481_p0 }
  0x29   : > { %p1477_p13 = pneg %p1476_p12 }
  0x2b   : > { %p1484_p7 = pnand %p1483_p4, %p1477_p13 }
  0x2d   : > { %1487 = shalt.err (!%p1484_p7)
}
  0x2e   : > { %1308 = dma.hbm_to_vmem [thread:$0]  (!%p1665_p5), %s1897_s1, 128, %s1671_s17, [#allocation3], %s1565_s26, %s1565_s26, %s1566_s14  }
  0x2f   : > { %s1567_s15 = smov [#allocation6]   ;;  %s1568_s23 = smov [#allocation9]  }
  0x30   : > { %s376_s22 = sshll.u32 %s1567_s15, 4  ;;  %s421_s24 = sshll.u32 %s1568_s23, 4  ;;  %s377_s22 = int_to_ptr.vmem [resolvable:$true] %s376_s22  ;;  %s422_s24 = int_to_ptr.vmem [resolvable:$true] %s421_s24 }
  0x31   : > { %s1499_s27 = scalar_lea.vmem %s377_s22, 128  ;;  %p1507_p11 = scmp.lt.s32.totalorder %s377_s22, %s377_s22 }
  0x32   : > { %p1500_p8 = scmp.ne.s32.totalorder %s377_s22, %s1499_s27  ;;  %p1508_p12 = scmp.lt.s32.totalorder %s1499_s27, %s1499_s27 }
  0x34   : > { %p1502_p9 = pnand %p1500_p8, %p1675_p6  ;;  %p1509_p13 = por %p1508_p12, %p1507_p11 }
  0x36   : > { %p1503_p10 = pneg %p1502_p9 }
  0x38   : > { %p1510_p0 = pnand %p1509_p13, %p1503_p10 }
  0x3a   : > { %1513 = shalt.err (!%p1510_p0)
}
  0x3b   : > { %1314 = dma.hbm_to_vmem [thread:$0]  (!%p1665_p5), %s1900_s4, 128, %s377_s22, [#allocation5], %s1565_s26, %s1565_s26, %s1566_s14  }
  0x3c   : > { %s1525_s19 = scalar_lea.vmem %s422_s24, 64  ;;  %p1533_p8 = scmp.lt.s32.totalorder %s422_s24, %s422_s24 }
  0x3d   : > { %p1526_p1 = scmp.ne.s32.totalorder %s422_s24, %s1525_s19  ;;  %p1534_p9 = scmp.lt.s32.totalorder %s1525_s19, %s1525_s19 }
  0x3f   : > { %p1528_p4 = pnand %p1526_p1, %p1675_p6  ;;  %p1535_p11 = por %p1534_p9, %p1533_p8 }
  0x41   : > { %p1529_p7 = pneg %p1528_p4 }
  0x43   : > { %p1536_p10 = pnand %p1535_p11, %p1529_p7 }
  0x45   : > { %1539 = shalt.err (!%p1536_p10)
}
  0x46   : > { %1320 = dma.hbm_to_vmem [thread:$0]  (!%p1665_p5), %s1908_s12, 64, %s422_s24, [#allocation8]  }
  0x47   : > { %441 = sbr.rel (%p1657_p3) target bundleno = 1708 (0x6ac), region = 72 }
  0x4c   : > { %1545 = dma.done.wait (%p1321_p2), [#allocation3], 128  }
  0x4d   : > { %1547 = vsyncadd (%p1321_p2), [#allocation3], 4294967168 }
  0x4e   : > { %1549 = dma.done.wait (%p1321_p2), [#allocation5], 384  }
  0x4f   : > { %1551 = vsyncadd (%p1321_p2), [#allocation5], 4294966912 }
  0x50   : > { %1553 = dma.done.wait (%p1321_p2), [#allocation8], 192  }
  0x51   : > { %1555 = vsyncadd (%p1321_p2), [#allocation8], 4294967104  ;;  %p499_p3 = scmp.lt.s32.totalorder %s1652_s28, 1  ;;  %v1569_v0 = vmov 0.0   ;;  %s1570_s14 = smov 7   ;;  %vm1572_vm0 = vmmov 0   ;;  %v547_v8 = vlaneseq }
  0x52   : > { %1223 = vmatprep.subr.bf16.mxu0 %v1569_v0  ;;  %1231 = vmatprep.subr.bf16.mxu1 %v1569_v0  ;;  %s1571_s15 = smov 1   ;;  %v1573_v3 = vmov 0   ;;  %v511_v4 = vld [vmem:[#allocation4 + $0x8] sm:$0xff]  ;;  %s1574_s22 = smov 127   ;;  %v510_v5 = vld [vmem:[#allocation4] sm:$0xff]  ;;  %v512_v6 = vld [vmem:[%s1899_s3] sm:$0xff] }
  0x53   : > { %s1914_s28 = smov (!%p499_p3, %s1652_s28), 1  ;;  %1227 = vmatprep.mubr.msk.bf16.mxu0 %vm1572_vm0, %v1569_v0  ;;  %1237 = vmatprep.mubr.msk.bf16.mxu1 %vm1572_vm0, %v1569_v0  ;;  %s1575_s23 = smov 121   ;;  %v513_v7 = vld [vmem:[%s1899_s3 + $0x8] sm:$0xff]  ;;  %v1771_v9 = vand.u32 127, %v547_v8  ;;  %vm578_vm3 = vcmask 1043456   ;;  %v1397_v19 = vld [vmem:[#allocation2] sm:$0xff]  }
  0x54   : > { %s1174_s29 = sshll.u32 %s1914_s28, 2  ;;  %1356 = vset.pattern.permute.xlu1 %v1573_v3  ;;  %1355 = vset.pattern.permute.xlu0 %v1573_v3  ;;  %vm574_vm4 = vcmask 195584   ;;  %v517_v36 = vld [vmem:[%s1901_s5 + $0x8] sm:$0xff]  ;;  %v516_v37 = vld [vmem:[%s1901_s5] sm:$0xff]  ;;  %v1398_v58 = vld [vmem:[#allocation6] sm:$0xff]   ;;  %vm677_vm5 = vcmask 392192  }
  0x55   : > { %s502_s26 = scalar_lea.vmem %s1896_s0, %s1174_s29  ;;  %vm550_vm1 = vcmp.ge.s32.totalorder %v1771_v9, 7  ;;  %vm549_vm2 = vcmp.ge.s32.totalorder %v1771_v9, 1  ;;  %v519_v38 = vld [vmem:[%s1902_s6 + $0x8] sm:$0xff]  ;;  %v518_v39 = vld [vmem:[%s1902_s6] sm:$0xff]  ;;  %v1405_v9 = vld [vmem:[%s1906_s10 + $0x10] sm:$0xff]   ;;  %vm949_vm6 = vcmask 130048  }
  0x56   : > { %v551_v1 = vld [vmem:[%s502_s26] sm:$0xf]  ;;  %vm1011_vm7 = vcmask 261120   ;;  %s1175_s26 = sshll.u32 %s1914_s28, 3 }
  0x57   : > { %v552_v2 = vunpack.c.l.bf16 %v551_v1  ;;  %s506_s17 = scalar_lea.vmem %s1909_s13, %s1175_s26 }
  0x59   : > { %560 = vrot.lane.b32.xlu0 %v552_v2, %s1570_s14  ;;  %553 = vrot.lane.b32.xlu1 %v552_v2, %s1571_s15 }
  0x5d   : > { %562 = vrot.lane.b32.xlu0 %v552_v2, %s1574_s22  ;;  %555 = vrot.lane.b32.xlu1 %v552_v2, %s1575_s23 }
  0x61   : > { %630 = vperm.xlu1 %1356, %v511_v4   ;;  %625 = vperm.xlu0 %1355, %v510_v5  }
  0x65   : > { %637 = vperm.xlu1 %1356, %v512_v6   ;;  %642 = vperm.xlu0 %1355, %v513_v7  }
  0xcb   : > { %v561_v10 = vpop.permute.xlu0 %560  ;;  %v554_v11 = vpop.permute.xlu1 %553 }
  0xcf   : > { %v563_v12 = vpop.permute.xlu0 %562  ;;  %v556_v14 = vpop.permute.xlu1 %555 }
  0xd0   : > { %v566_v13 = vsel %vm550_vm1, %v561_v10, %v563_v12  ;;  %v559_v16 = vsel %vm549_vm2, %v554_v11, %v556_v14  ;;  %v522_v14 = vld [vmem:[%s1904_s8] sm:$0xff] }
  0xd1   : > { %v568_v15 = vpack.c.bf16 %v566_v13, %v566_v13  ;;  %v567_v18 = vpack.c.bf16 %v552_v2, %v559_v16  ;;  %v523_v13 = vld [vmem:[%s1904_s8 + $0x8] sm:$0xff] }
  0xd2   : > { %v525_v16 = vld [vmem:[%s1905_s9 + $0x8] sm:$0xff] }
  0xd3   : > { %v580_v17 = vsel %vm578_vm3, %v568_v15, 0  ;;  %v1400_v15 = vld [vmem:[%s1906_s10 + $0x38] sm:$0xff]  }
  0xd4   : > { %1224 = vmatpush3.bf16.msra.mxu0 %v580_v17  ;;  %v524_v17 = vld [vmem:[%s1905_s9] sm:$0xff] }
  0xd5   : > { %1225 = vmatprep.subr.bf16.mxu0 %v1569_v0 }
  0xd8   : > { %1226 = vmatpush3.bf16.msra.mxu0 %v567_v18  ;;  %v1401_v18 = vld [vmem:[%s1906_s10 + $0x30] sm:$0xff]  }
  0xd9   : > { %1241 = vmatprep.subr.bf16.mxu0 %v1569_v0 }
  0xdb   : > { %1228 = vmatmul.mubr.msk.bf16.vlgmr.msra.gmra.mxu0 %vm574_vm4, %v1397_v19  ;;  %v1402_v19 = vld [vmem:[%s1906_s10 + $0x28] sm:$0xff]  }
  0xdc   : > { %1247 = vmatprep.mubr.msk.bf16.mxu0 %vm1572_vm0, %v1569_v0  ;;  %v631_v20 = vpop.permute.xlu1 %630  ;;  %v626_v21 = vpop.permute.xlu0 %625 }
  0xe0   : > { %v638_v24 = vpop.permute.xlu1 %637  ;;  %v643_v29 = vpop.permute.xlu0 %642 }
 0x19b   : > { %v1783_v22 = vpop.f32.mrf.mxu0 }
 0x19c   : > { %v633_v23 = vmul.f32 %v626_v21, %v1783_v22 }
 0x19d   : > { %v1229_v25 = vpop.f32.mrf.mxu0 }
 0x19e   : > { %v645_v27 = vadd.f32 %v638_v24, %v633_v23 }
 0x19f   : > { %v1786_v26 = vpop.f32.mrf.mxu0 }
 0x1a0   : > { %v634_v28 = vmul.f32 %v631_v20, %v1786_v26  ;;  %v647_v32 = vmax.f32 %v645_v27, 0.0  ;;  %v1403_v20 = vld [vmem:[%s1906_s10 + $0x20] sm:$0xff]  }
 0x1a1   : > { %v1230_v30 = vpop.f32.mrf.mxu0 }
 0x1a2   : > { %v646_v31 = vadd.f32 %v643_v29, %v634_v28 }
 0x1a4   : > { %v648_v33 = vmax.f32 %v646_v31, 0.0 }
 0x1a6   : > { %v1362_v34 = vpack.i.bf16 %v648_v33, %v647_v32  ;;  %v670_v35 = vpack.c.bf16 %v648_v33, %v647_v32 }
 0x1a8   : > { %1363 = vrot.lane.b32.xlu0 %v1362_v34, %s1574_s22  ;;  %1358 = vrot.lane.b32.xlu1 %v1362_v34, %s1570_s14 }
 0x1ac   : > { %1373 = vrot.lane.b32.xlu0 %v1362_v34, %s1575_s23  ;;  %1368 = vrot.lane.b32.xlu1 %v1362_v34, %s1571_s15 }
 0x1b0   : > { %729 = vperm.xlu0 %1355, %v517_v36   ;;  %724 = vperm.xlu1 %1356, %v516_v37  }
 0x1b4   : > { %741 = vperm.xlu0 %1355, %v519_v38   ;;  %736 = vperm.xlu1 %1356, %v518_v39  }
 0x21a   : > { %v1364_v40 = vpop.permute.xlu0 %1363  ;;  %v1359_v41 = vpop.permute.xlu1 %1358 }
 0x21b   : > { %v1366_v42 = vunpack.i.h.bf16 %v1364_v40  ;;  %v1365_v43 = vunpack.i.l.bf16 %v1364_v40  ;;  %v1361_v44 = vunpack.i.h.bf16 %v1359_v41  ;;  %v1360_v45 = vunpack.i.l.bf16 %v1359_v41  ;;  %v1399_v41 = vld [vmem:[#allocation7] sm:$0xff]  }
 0x21d   : > { %v667_v46 = vsel %vm550_vm1, %v1360_v45, %v1365_v43  ;;  %v668_v47 = vsel %vm550_vm1, %v1361_v44, %v1366_v42  ;;  %v1404_v42 = vld [vmem:[%s1906_s10 + $0x18] sm:$0xff]   ;;  %v1406_v43 = vld [vmem:[%s1906_s10 + $0x8] sm:$0xff]   ;;  %v1407_v44 = vld [vmem:[%s1906_s10] sm:$0xff]  }
 0x21e   : > { %v1374_v48 = vpop.permute.xlu0 %1373  ;;  %v1369_v49 = vpop.permute.xlu1 %1368  ;;  %v671_v50 = vpack.c.bf16 %v668_v47, %v667_v46 }
 0x21f   : > { %v1376_v51 = vunpack.i.h.bf16 %v1374_v48  ;;  %v1375_v52 = vunpack.i.l.bf16 %v1374_v48  ;;  %v1371_v53 = vunpack.i.h.bf16 %v1369_v49  ;;  %v1370_v54 = vunpack.i.l.bf16 %v1369_v49 }
 0x220   : > { %1232 = vmatpush3.bf16.msra.mxu1 %v671_v50 }
 0x221   : > { %1233 = vmatprep.subr.bf16.mxu1 %v1569_v0  ;;  %v657_v55 = vsel %vm549_vm2, %v1370_v54, %v1375_v52  ;;  %v658_v56 = vsel %vm549_vm2, %v1371_v53, %v1376_v51 }
 0x222   : > { %v669_v57 = vpack.c.bf16 %v658_v56, %v657_v55 }
 0x224   : > { %1234 = vmatpush3.bf16.msra.mxu1 %v670_v35 }
 0x225   : > { %1235 = vmatprep.subr.bf16.mxu1 %v1569_v0 }
 0x228   : > { %1236 = vmatpush3.bf16.msra.mxu1 %v669_v57 }
 0x229   : > { %1251 = vmatprep.subr.bf16.mxu1 %v1569_v0 }
 0x22b   : > { %1238 = vmatmul.mubr.msk.bf16.vlgmr.msra.gmra.mxu1 %vm677_vm5, %v1398_v58  ;;  %v725_v59 = vpop.permute.xlu1 %724  ;;  %v730_v60 = vpop.permute.xlu0 %729 }
 0x22c   : > { %1267 = vmatprep.mubr.msk.bf16.mxu1 %vm1572_vm0, %v1569_v0  ;;  %1252 = vmatpush3.bf16.msra.mxu1 %v1400_v15  ;;  %v546_v15 = vld [vmem:[#allocation9] sm:$0x7] }
 0x22d   : > { %1253 = vmatprep.subr.bf16.mxu1 %v1569_v0 }
 0x22f   : > { %v737_v1 = vpop.permute.xlu1 %736  ;;  %v742_v5 = vpop.permute.xlu0 %741 }
 0x230   : > { %1254 = vmatpush3.bf16.msra.mxu1 %v1401_v18 }
 0x231   : > { %1255 = vmatprep.subr.bf16.mxu1 %v1569_v0 }
 0x234   : > { %1256 = vmatpush3.bf16.msra.mxu1 %v1402_v19 }
 0x235   : > { %1257 = vmatprep.subr.bf16.mxu1 %v1569_v0 }
 0x238   : > { %1258 = vmatpush3.bf16.msra.mxu1 %v1403_v20 }
 0x239   : > { %1259 = vmatprep.subr.bf16.mxu1 %v1569_v0 }
 0x23c   : > { %1260 = vmatpush3.bf16.msra.mxu1 %v1404_v42 }
 0x23d   : > { %1261 = vmatprep.subr.bf16.mxu1 %v1569_v0 }
 0x240   : > { %1262 = vmatpush3.bf16.msra.mxu1 %v1405_v9 }
 0x241   : > { %1263 = vmatprep.subr.bf16.mxu1 %v1569_v0 }
 0x244   : > { %1264 = vmatpush3.bf16.msra.mxu1 %v1406_v43 }
 0x245   : > { %1265 = vmatprep.subr.bf16.mxu1 %v1569_v0 }
 0x248   : > { %1266 = vmatpush3.bf16.msra.mxu1 %v1407_v44 }
 0x2eb   : > { %v715_v61 = vpop.f32.mrf.mxu1 }
 0x2ec   : > { %v732_v62 = vmul.f32 %v725_v59, %v715_v61 }
 0x2ed   : > { %v1239_v63 = vpop.f32.mrf.mxu1 }
 0x2ee   : > { %v744_v3 = vadd.f32 %v737_v1, %v732_v62 }
 0x2ef   : > { %v718_v2 = vpop.f32.mrf.mxu1 }
 0x2f0   : > { %v733_v4 = vmul.f32 %v730_v60, %v718_v2  ;;  %v746_v8 = vmax.f32 %v744_v3, 0.0  ;;  %v1409_v3 = vld [vmem:[%s1907_s11 + $0x8] sm:$0xff]  }
 0x2f1   : > { %v1240_v6 = vpop.f32.mrf.mxu1 }
 0x2f2   : > { %v745_v7 = vadd.f32 %v742_v5, %v733_v4 }
 0x2f4   : > { %v747_v10 = vmax.f32 %v745_v7, 0.0 }
 0x2f6   : > { %v1382_v11 = vpack.i.bf16 %v747_v10, %v746_v8  ;;  %v769_v12 = vpack.c.bf16 %v747_v10, %v746_v8 }
 0x2f8   : > { %1383 = vrot.lane.b32.xlu0 %v1382_v11, %s1574_s22  ;;  %1378 = vrot.lane.b32.xlu1 %v1382_v11, %s1570_s14 }
 0x2fc   : > { %1393 = vrot.lane.b32.xlu0 %v1382_v11, %s1575_s23  ;;  %1388 = vrot.lane.b32.xlu1 %v1382_v11, %s1571_s15 }
 0x300   : > { %829 = vperm.xlu0 %1355, %v523_v13   ;;  %824 = vperm.xlu1 %1356, %v522_v14  }
 0x304   : > { %841 = vperm.xlu0 %1355, %v525_v16   ;;  %836 = vperm.xlu1 %1356, %v524_v17  }
 0x36a   : > { %v1384_v21 = vpop.permute.xlu0 %1383  ;;  %v1379_v23 = vpop.permute.xlu1 %1378 }
 0x36b   : > { %v1386_v24 = vunpack.i.h.bf16 %v1384_v21  ;;  %v1385_v25 = vunpack.i.l.bf16 %v1384_v21  ;;  %v1381_v27 = vunpack.i.h.bf16 %v1379_v23  ;;  %v1380_v28 = vunpack.i.l.bf16 %v1379_v23 }
 0x36d   : > { %v767_v29 = vsel %vm550_vm1, %v1381_v27, %v1386_v24  ;;  %v766_v30 = vsel %vm550_vm1, %v1380_v28, %v1385_v25 }
 0x36e   : > { %v770_v31 = vpack.c.bf16 %v767_v29, %v766_v30  ;;  %v1394_v32 = vpop.permute.xlu0 %1393  ;;  %v1389_v33 = vpop.permute.xlu1 %1388 }
 0x36f   : > { %v1396_v34 = vunpack.i.h.bf16 %v1394_v32  ;;  %v1395_v35 = vunpack.i.l.bf16 %v1394_v32  ;;  %v1391_v36 = vunpack.i.h.bf16 %v1389_v33  ;;  %v1390_v37 = vunpack.i.l.bf16 %v1389_v33 }
 0x370   : > { %1242 = vmatpush3.bf16.msra.mxu0 %v770_v31 }
 0x371   : > { %1243 = vmatprep.subr.bf16.mxu0 %v1569_v0  ;;  %v757_v38 = vsel %vm549_vm2, %v1391_v36, %v1396_v34  ;;  %v756_v39 = vsel %vm549_vm2, %v1390_v37, %v1395_v35 }
 0x372   : > { %v768_v40 = vpack.c.bf16 %v757_v38, %v756_v39 }
 0x374   : > { %1244 = vmatpush3.bf16.msra.mxu0 %v769_v12 }
 0x375   : > { %1245 = vmatprep.subr.bf16.mxu0 %v1569_v0 }
 0x378   : > { %1246 = vmatpush3.bf16.msra.mxu0 %v768_v40 }
 0x37b   : > { %1248 = vmatmul.mubr.msk.bf16.vlgmr.msra.gmra.mxu0 %vm677_vm5, %v1399_v41  ;;  %v825_v45 = vpop.permute.xlu1 %824  ;;  %v830_v48 = vpop.permute.xlu0 %829 }
 0x37f   : > { %v837_v53 = vpop.permute.xlu1 %836  ;;  %v842_v57 = vpop.permute.xlu0 %841 }
 0x43b   : > { %v813_v46 = vpop.f32.mrf.mxu0 }
 0x43c   : > { %v820_v47 = vadd.f32 %v813_v46, %v1783_v22  ;;  %v1408_v22 = vld [vmem:[%s1907_s11] sm:$0xff]  }
 0x43d   : > { %v1249_v49 = vpop.f32.mrf.mxu0  ;;  %1273 = vmatprep.mubr.msk.bf16.mxu0 %vm949_vm6, %v1408_v22 }
 0x43e   : > { %v832_v50 = vmul.f32 %v825_v45, %v820_v47 }
 0x43f   : > { %v816_v51 = vpop.f32.mrf.mxu0 }
 0x440   : > { %v821_v52 = vadd.f32 %v816_v51, %v1786_v26  ;;  %v844_v55 = vadd.f32 %v837_v53, %v832_v50 }
 0x441   : > { %v1250_v54 = vpop.f32.mrf.mxu0 }
 0x442   : > { %v833_v56 = vmul.f32 %v830_v48, %v821_v52  ;;  %v846_v59 = vmax.f32 %v844_v55, 0.0 }
 0x444   : > { %v845_v58 = vadd.f32 %v842_v57, %v833_v56 }
 0x446   : > { %v847_v60 = vmax.f32 %v845_v58, 0.0 }
 0x448   : > { %v848_v61 = vpack.c.bf16 %v847_v60, %v846_v59 }
 0x44a   : > { %1268 = vmatmul.mubr.bf16.vlgmr.msra.gmra.mxu1 %v848_v61 }
 0x50a   : > { %v931_v62 = vpop.f32.mrf.mxu1 }
 0x50c   : > { %v1269_v63 = vpop.f32.mrf.mxu1 }
 0x50e   : > { %v934_v1 = vpop.f32.mrf.mxu1 }
 0x50f   : > { %v938_v26 = vpack.c.bf16 %v934_v1, %v931_v62 }
 0x510   : > { %v1270_v2 = vpop.f32.mrf.mxu1 }
 0x511   : > { %1271 = vmatprep.subr.bf16.mxu0 %v938_v26 }
 0x512   : > { %1272 = vmatpush3.bf16.msra.mxu0 %v938_v26 }
 0x513   : > { %1277 = vmatprep.subr.bf16.mxu0 %v1569_v0 }
 0x515   : > { %1274 = vmatmul.mubr.msk.bf16.vlgmr.msra.gmra.mxu0 %vm949_vm6, %v1409_v3 }
 0x516   : > { %1281 = vmatprep.mubr.msk.bf16.mxu0 %vm1572_vm0, %v1569_v0 }
 0x5d5   : > { %v1275_v4 = vpop.f32.mrf.mxu0 }
 0x5d6   : > { %v1007_v7 = vmax.f32 %v1275_v4, 0.0 }
 0x5d7   : > { %v990_v5 = vpop.f32.mrf.mxu0 }
 0x5d8   : > { %v1005_v13 = vmax.f32 %v990_v5, 0.0 }
 0x5d9   : > { %v1276_v6 = vpop.f32.mrf.mxu0 }
 0x5da   : > { %v1008_v8 = vmax.f32 %v1276_v6, 0.0 }
 0x5db   : > { %v993_v10 = vpop.f32.mrf.mxu0 }
 0x5dc   : > { %v1010_v11 = vpack.c.bf16 %v1008_v8, %v1007_v7  ;;  %v1006_v12 = vmax.f32 %v993_v10, 0.0 }
 0x5de   : > { %1278 = vmatpush3.bf16.msra.mxu0 %v1010_v11  ;;  %v1009_v14 = vpack.c.bf16 %v1006_v12, %v1005_v13 }
 0x5df   : > { %1279 = vmatprep.subr.bf16.mxu0 %v1569_v0 }
 0x5e2   : > { %1280 = vmatpush3.bf16.msra.mxu0 %v1009_v14 }
 0x5e5   : > { %1282 = vmatmul.mubr.msk.bf16.vlgmr.msra.gmra.mxu0 %vm1011_vm7, %v546_v15 }
 0x6a5   : > { %v1049_v16 = vpop.f32.mrf.mxu0 }
 0x6a6   : > { %1055 = vst [vmem:[%s506_s17] sm:$0x1f] %v1049_v16 }
 0x6a7   : > { %v1283_v17 = vpop.f32.mrf.mxu0 }
 0x6a9   : > { %v1052_v18 = vpop.f32.mrf.mxu0 }
 0x6ab   : > { %v1284_v19 = vpop.f32.mrf.mxu0 }
 0x6ac PF: > { %s26_s25 = sadd.s32 1, %s1558_s25  }
 0x6ad   : > { %p23_p2 = scmp.ge.s32.totalorder %s26_s25, 4  }
 0x6af   :  { %25 = sbr.rel (!%p23_p2) target bundleno = 3 (0x3), region = 123 }
 0x6b4   :  { %1075 = vsyncpa [#allocation3], 1 }
 0x6b5   :  { %1077 = vsyncpa [#allocation3 + $0x1], 1 }
 0x6b6   :  { %1078 = vsyncpa [#allocation5], 1 }
 0x6b7   :  { %1079 = vsyncpa [#allocation8], 1 }

</bundles_post_ra>
